<compile_context>
chip_gen: v7x
topology: tpu7x:2x2x1
jax: 0.10.0
libtpu: 0.0.40
codegen_flags: <defaults>
</compile_context>

<pallas_src>
import functools

import jax
import jax.numpy as jnp
from jax.experimental import pallas as pl
from jax.experimental.pallas import tpu as pltpu


def _round_up(x, m):
    return (x + m - 1) // m * m


# ----------------------------------------------------------------------------
# Kernel 1: tiled conv-as-matmul, fused bias + optional output ReLU
#   out = [relu?]( x @ w + b ),  bf16 operands, f32 accumulate
# ----------------------------------------------------------------------------
def _conv_mm_kernel(relu_out, x_ref, w_ref, b_ref, o_ref, acc_ref):
    k = pl.program_id(2)

    @pl.when(k == 0)
    def _():
        acc_ref[...] = jnp.zeros_like(acc_ref)

    acc_ref[...] += jnp.dot(x_ref[...], w_ref[...],
                            preferred_element_type=jnp.float32)

    @pl.when(k == pl.num_programs(2) - 1)
    def _():
        y = acc_ref[...] + b_ref[...]          # f32 epilogue
        if relu_out:
            y = jnp.maximum(y, 0.0)
        o_ref[...] = y.astype(o_ref.dtype)


def conv_mm(x, w, b, *, relu_out=False,
            tm_max=256, tn_max=256, tk_max=512, out_dtype=jnp.bfloat16):
    """x: (M, K) im2col patches, w: (K, N), b: (N,). Returns (M, N)."""
    M, K = x.shape
    _, N = w.shape
    tm = min(tm_max, _round_up(M, 8))
    tn = min(tn_max, _round_up(N, 128))
    tk = min(tk_max, _round_up(K, 128))
    Mp, Np, Kp = _round_up(M, tm), _round_up(N, tn), _round_up(K, tk)

    xp = jnp.pad(x.astype(jnp.bfloat16), ((0, Mp - M), (0, Kp - K)))
    wp = jnp.pad(w.astype(jnp.bfloat16), ((0, Kp - K), (0, Np - N)))
    bp = jnp.pad(b.astype(jnp.float32).reshape(1, N), ((0, 0), (0, Np - N)))

    kernel = functools.partial(_conv_mm_kernel, relu_out)
    out = pl.pallas_call(
        kernel,
        out_shape=jax.ShapeDtypeStruct((Mp, Np), out_dtype),
        grid=(Mp // tm, Np // tn, Kp // tk),
        in_specs=[
            pl.BlockSpec((tm, tk), lambda i, j, k: (i, k)),
            pl.BlockSpec((tk, tn), lambda i, j, k: (k, j)),
            pl.BlockSpec((1, tn), lambda i, j, k: (0, j)),
        ],
        out_specs=pl.BlockSpec((tm, tn), lambda i, j, k: (i, j)),
        scratch_shapes=[pltpu.VMEM((tm, tn), jnp.float32)],
        compiler_params=pltpu.CompilerParams(
            dimension_semantics=("parallel", "parallel", "arbitrary"),
            vmem_limit_bytes=48 * 1024 * 1024),
        cost_estimate=pl.CostEstimate(
            flops=2 * Mp * Np * Kp,
            bytes_accessed=2 * (Mp * Kp + Kp * Np + Mp * Np),
            transcendentals=0),
    )(xp, wp, bp)
    return out[:M, :N]


# ----------------------------------------------------------------------------
# Kernel 2: one fused residual layer
#   h = ReLU(x) @ W3   (3x3 conv via im2col, accumulated over K3 in VMEM)
#   y = x + ReLU(h) @ W1   [+ final ReLU on the last layer of the stack]
# `h` never leaves VMEM; only one pallas_call per residual layer.
# ----------------------------------------------------------------------------
def _res_layer_kernel(relu_out, p_ref, w3_ref, w1_ref, xres_ref, o_ref, h_acc):
    k = pl.program_id(1)

    @pl.when(k == 0)
    def _():
        h_acc[...] = jnp.zeros_like(h_acc)

    # ReLU fused onto the patches: valid because conv padding is zero
    # (relu(0) == 0), so relu(patch(x)) == patch(relu(x)).
    x = jnp.maximum(p_ref[...], 0)
    h_acc[...] += jnp.dot(x, w3_ref[...], preferred_element_type=jnp.float32)

    @pl.when(k == pl.num_programs(1) - 1)
    def _():
        h = jnp.maximum(h_acc[...], 0.0).astype(w1_ref.dtype)      # ReLU -> bf16
        y = jnp.dot(h, w1_ref[...], preferred_element_type=jnp.float32)
        y = y + xres_ref[...].astype(jnp.float32)                  # residual add
        if relu_out:
            y = jnp.maximum(y, 0.0)
        o_ref[...] = y.astype(o_ref.dtype)


def residual_layer(p3, w3, w1, x_res, *, relu_out,
                   tm_max=256, tk_max=512, out_dtype=jnp.bfloat16):
    """p3: (M, K3) patches of x, w3: (K3, R), w1: (R, C), x_res: (M, C)."""
    M, K3 = p3.shape
    _, R = w3.shape
    _, C = w1.shape
    tm = min(tm_max, _round_up(M, 8))
    tk = min(tk_max, _round_up(K3, 128))
    Mp, Kp = _round_up(M, tm), _round_up(K3, tk)
    Rp, Cp = _round_up(R, 128), _round_up(C, 128)

    pp = jnp.pad(p3.astype(jnp.bfloat16), ((0, Mp - M), (0, Kp - K3)))
    w3p = jnp.pad(w3.astype(jnp.bfloat16), ((0, Kp - K3), (0, Rp - R)))
    w1p = jnp.pad(w1.astype(jnp.bfloat16), ((0, Rp - R), (0, Cp - C)))
    xrp = jnp.pad(x_res.astype(jnp.bfloat16), ((0, Mp - M), (0, Cp - C)))

    kernel = functools.partial(_res_layer_kernel, relu_out)
    out = pl.pallas_call(
        kernel,
        out_shape=jax.ShapeDtypeStruct((Mp, Cp), out_dtype),
        grid=(Mp // tm, Kp // tk),
        in_specs=[
            pl.BlockSpec((tm, tk), lambda i, k: (i, k)),
            pl.BlockSpec((tk, Rp), lambda i, k: (k, 0)),
            pl.BlockSpec((Rp, Cp), lambda i, k: (0, 0)),   # resident across grid
            pl.BlockSpec((tm, Cp), lambda i, k: (i, 0)),
        ],
        out_specs=pl.BlockSpec((tm, Cp), lambda i, k: (i, 0)),
        scratch_shapes=[pltpu.VMEM((tm, Rp), jnp.float32)],
        compiler_params=pltpu.CompilerParams(
            dimension_semantics=("parallel", "arbitrary"),
            vmem_limit_bytes=48 * 1024 * 1024),
        cost_estimate=pl.CostEstimate(
            flops=2 * Mp * Kp * Rp + 2 * Mp * Rp * Cp,
            bytes_accessed=2 * (Mp * Kp + Kp * Rp + Rp * Cp + 2 * Mp * Cp),
            transcendentals=0),
    )(pp, w3p, w1p, xrp)
    return out[:M, :C]


# ----------------------------------------------------------------------------
# Plain-JAX glue: im2col patch extraction & weight packing (done once)
# ----------------------------------------------------------------------------
def extract_patches(x_nhwc, kh, kw, stride, pad):
    # TODO(synk): move patch construction in-kernel (halo'd NHWC tiles) to
    # avoid materializing the kh*kw-inflated matrix in HBM.
    B, H, W, C = x_nhwc.shape
    xp = jnp.pad(x_nhwc, ((0, 0), (pad, pad), (pad, pad), (0, 0)))
    Hp, Wp = H + 2 * pad, W + 2 * pad
    Ho = (Hp - kh) // stride + 1
    Wo = (Wp - kw) // stride + 1
    cols = []
    for di in range(kh):
        for dj in range(kw):
            cols.append(
                xp[:, di:di + stride * (Ho - 1) + 1:stride,
                      dj:dj + stride * (Wo - 1) + 1:stride, :])
    patches = jnp.concatenate(cols, axis=-1)        # (B, Ho, Wo, kh*kw*C)
    return patches.reshape(B * Ho * Wo, kh * kw * C), (B, Ho, Wo)


def conv_weight_to_mat(w_oihw):
    # PyTorch (Cout, Cin, kh, kw) -> (kh*kw*Cin, Cout), matching patch order.
    Cout, Cin, kh, kw = w_oihw.shape
    return jnp.transpose(w_oihw, (2, 3, 1, 0)).reshape(kh * kw * Cin, Cout)


def pack_params(params):
    """One-time: OIHW conv weights -> bf16 (K, N) matmul matrices."""
    bf16 = jnp.bfloat16
    packed = {
        "w1": conv_weight_to_mat(params["w1"]).astype(bf16),
        "b1": params["b1"].astype(jnp.float32),
        "w2": conv_weight_to_mat(params["w2"]).astype(bf16),
        "b2": params["b2"].astype(jnp.float32),
        "w3": conv_weight_to_mat(params["w3"]).astype(bf16),
        "b3": params["b3"].astype(jnp.float32),
        "res": [
            {"w3x3": conv_weight_to_mat(rp["w3x3"]).astype(bf16),
             "w1x1": conv_weight_to_mat(rp["w1x1"]).astype(bf16)}
            for rp in params["res"]
        ],
    }
    return packed


# ----------------------------------------------------------------------------
# Parameter init (deterministic, synthetic)
# ----------------------------------------------------------------------------
def init_params(key, input_channels, n_hidden, n_res_layers, n_res_hidden):
    keys = jax.random.split(key, 6 + 2 * n_res_layers)

    def w(k, shape, fan_in):
        return (jax.random.normal(k, shape, jnp.float32) / jnp.sqrt(fan_in)
                ).astype(jnp.float32)

    p = {
        "w1": w(keys[0], (n_hidden // 2, input_channels, 4, 4), input_channels * 16),
        "b1": w(keys[1], (n_hidden // 2,), 1.0) * 0.1,
        "w2": w(keys[2], (n_hidden, n_hidden // 2, 4, 4), (n_hidden // 2) * 16),
        "b2": w(keys[3], (n_hidden,), 1.0) * 0.1,
        "w3": w(keys[4], (n_hidden, n_hidden, 3, 3), n_hidden * 9),
        "b3": w(keys[5], (n_hidden,), 1.0) * 0.1,
        "res": [],
    }
    for i in range(n_res_layers):
        p["res"].append({
            "w3x3": w(keys[6 + 2 * i], (n_res_hidden, n_hidden, 3, 3), n_hidden * 9),
            "w1x1": w(keys[7 + 2 * i], (n_hidden, n_res_hidden, 1, 1), n_res_hidden),
        })
    return p


# ----------------------------------------------------------------------------
# Encoder forward (Pallas-backed).  Activations live in bf16 between layers.
# ----------------------------------------------------------------------------
def encoder_forward(packed, x_nchw):
    x = jnp.transpose(x_nchw, (0, 2, 3, 1)).astype(jnp.bfloat16)   # NHWC bf16

    # conv1: k=4, s=2, p=1 + ReLU
    p, (B, Ho, Wo) = extract_patches(x, 4, 4, 2, 1)
    y = conv_mm(p, packed["w1"], packed["b1"], relu_out=True)
    x = y.reshape(B, Ho, Wo, -1)

    # conv2: k=4, s=2, p=1 + ReLU
    p, (B, Ho, Wo) = extract_patches(x, 4, 4, 2, 1)
    y = conv_mm(p, packed["w2"], packed["b2"], relu_out=True)
    x = y.reshape(B, Ho, Wo, -1)

    # conv3: k=3, s=1, p=1 (no ReLU)
    p, (B, Ho, Wo) = extract_patches(x, 3, 3, 1, 1)
    y = conv_mm(p, packed["w3"], packed["b3"])
    x = y.reshape(B, Ho, Wo, -1)

    # residual stack: each layer is a single fused pallas_call
    B, H, W, C = x.shape
    x_flat = x.reshape(B * H * W, C)
    n_layers = len(packed["res"])
    for li, rp in enumerate(packed["res"]):
        p3, _ = extract_patches(x_flat.reshape(B, H, W, C), 3, 3, 1, 1)
        x_flat = residual_layer(p3, rp["w3x3"], rp["w1x1"], x_flat,
                                relu_out=(li == n_layers - 1))

    x = x_flat.reshape(B, H, W, C).astype(jnp.float32)
    return jnp.transpose(x, (0, 3, 1, 2))                          # NCHW f32


# ----------------------------------------------------------------------------
# Reference (lax.conv path) with the same bf16 operand rounding / bf16
# activation storage, so the comparison isolates kernel correctness.
# ----------------------------------------------------------------------------
def ref_forward(params, x):
    bf16 = jnp.bfloat16

    def conv(xa, w, b, stride, pad):
        out = jax.lax.conv_general_dilated(
            xa.astype(bf16), w.astype(bf16), (stride, stride),
            [(pad, pad), (pad, pad)],
            dimension_numbers=("NCHW", "OIHW", "NCHW"),
            preferred_element_type=jnp.float32)
        if b is not None:
            out = out + b.astype(jnp.float32)[None, :, None, None]
        return out

    x = x.astype(bf16)
    x = jax.nn.relu(conv(x, params["w1"], params["b1"], 2, 1)).astype(bf16)
    x = jax.nn.relu(conv(x, params["w2"], params["b2"], 2, 1)).astype(bf16)
    x = conv(x, params["w3"], params["b3"], 1, 1).astype(bf16)
    n = len(params["res"])
    for li, rp in enumerate(params["res"]):
        h = conv(jax.nn.relu(x), rp["w3x3"], None, 1, 1)
        h = conv(jax.nn.relu(h).astype(bf16), rp["w1x1"], None, 1, 0)
        xn = x.astype(jnp.float32) + h
        if li == n - 1:
            xn = jax.nn.relu(xn)
        x = xn.astype(bf16)
    return x.astype(jnp.float32)


if __name__ == "__main__":
    # small shapes: batch=2, input_channels=4, spatial=16x16,
    # n_hidden=32, n_res_layers=2, n_res_hidden=8
    key = jax.random.PRNGKey(0)
    k_in, k_par = jax.random.split(key)
    x = jax.random.normal(k_in, (2, 4, 16, 16), jnp.float32)
    params = init_params(k_par, input_channels=4, n_hidden=32,
                         n_res_layers=2, n_res_hidden=8)
    packed = pack_params(params)

    fwd = jax.jit(encoder_forward)
    out = jax.block_until_ready(fwd(packed, x))
    ref = jax.block_until_ready(ref_forward(params, x))

    assert out.shape == (2, 32, 4, 4), out.shape
    max_err = float(jnp.max(jnp.abs(out - ref)))
    assert jnp.allclose(out, ref, atol=2e-2, rtol=2e-2), max_err
    print("KERNEL_OK")
</pallas_src>

<mosaic_0001>
module attributes {stable_mosaic.version = 11 : i64} {
  func.func @_conv_mm_kernel(%arg0: i32, %arg1: i32, %arg2: i32, %arg3: memref<128x128xbf16, #tpu.memory_space<vmem>>, %arg4: memref<128x128xbf16, #tpu.memory_space<vmem>>, %arg5: memref<1x128xf32, #tpu.memory_space<vmem>>, %arg6: memref<128x128xbf16, #tpu.memory_space<vmem>>, %arg7: memref<128x128xf32, #tpu.memory_space<vmem>>) attributes {dimension_semantics = [#tpu.dimension_semantics<parallel>, #tpu.dimension_semantics<parallel>, #tpu.dimension_semantics<arbitrary>], iteration_bounds = array<i64: 1, 1, 1>, scalar_prefetch = 0 : i64, scratch_operands = 1 : i64, tpu.core_type = #tpu.core_type<tc>, window_params = [{transform_indices = @transform_0, window_bounds = array<i64: 128, 128>}, {transform_indices = @transform_1, window_bounds = array<i64: 128, 128>}, {transform_indices = @transform_2, window_bounds = array<i64: 1, 128>}, {transform_indices = @transform_3, window_bounds = array<i64: 128, 128>}]} {
    %c0_i32 = arith.constant 0 : i32
    %0 = arith.cmpi eq, %arg2, %c0_i32 : i32
    %1 = arith.extui %0 : i1 to i32
    %c0_i32_0 = arith.constant 0 : i32
    %2 = arith.cmpi ne, %1, %c0_i32_0 : i32
    scf.if %2 {
      %cst_10 = arith.constant 0.000000e+00 : f32
      %12 = vector.broadcast %cst_10 : f32 to vector<128x128xf32>
      %c0_11 = arith.constant 0 : index
      %c0_12 = arith.constant 0 : index
      %13 = vector.load %arg7[%c0_11, %c0_12] : memref<128x128xf32, #tpu.memory_space<vmem>>, vector<128x128xf32>
      tpu.vector_store %arg7[%c0_11, %c0_12], %12 {strides = array<i32>} : memref<128x128xf32, #tpu.memory_space<vmem>>, vector<128x128xf32>,
    } else {
    }
    %c0 = arith.constant 0 : index
    %c0_1 = arith.constant 0 : index
    %3 = vector.load %arg7[%c0, %c0_1] : memref<128x128xf32, #tpu.memory_space<vmem>>, vector<128x128xf32>
    %c0_2 = arith.constant 0 : index
    %c0_3 = arith.constant 0 : index
    %4 = vector.load %arg3[%c0_2, %c0_3] : memref<128x128xbf16, #tpu.memory_space<vmem>>, vector<128x128xbf16>
    %c0_4 = arith.constant 0 : index
    %c0_5 = arith.constant 0 : index
    %5 = vector.load %arg4[%c0_4, %c0_5] : memref<128x128xbf16, #tpu.memory_space<vmem>>, vector<128x128xbf16>
    %cst = arith.constant dense<0.000000e+00> : vector<128x128xf32>
    %6 = tpu.matmul %4, %5, %cst {dimension_numbers = #tpu.dot_dimension_numbers<[1], [0], [0], [1], [0, 0, 1, 1], [], []>} : vector<128x128xbf16>, vector<128x128xbf16>, vector<128x128xf32> -> vector<128x128xf32>
    %7 = arith.addf %3, %6 : vector<128x128xf32>
    %c0_6 = arith.constant 0 : index
    %c0_7 = arith.constant 0 : index
    %8 = vector.load %arg7[%c0_6, %c0_7] : memref<128x128xf32, #tpu.memory_space<vmem>>, vector<128x128xf32>
    tpu.vector_store %arg7[%c0_6, %c0_7], %7 {strides = array<i32>} : memref<128x128xf32, #tpu.memory_space<vmem>>, vector<128x128xf32>,
    %c0_i32_8 = arith.constant 0 : i32
    %9 = arith.cmpi eq, %arg2, %c0_i32_8 : i32
    %10 = arith.extui %9 : i1 to i32
    %c0_i32_9 = arith.constant 0 : i32
    %11 = arith.cmpi ne, %10, %c0_i32_9 : i32
    scf.if %11 {
      %c0_10 = arith.constant 0 : index
      %c0_11 = arith.constant 0 : index
      %12 = vector.load %arg7[%c0_10, %c0_11] : memref<128x128xf32, #tpu.memory_space<vmem>>, vector<128x128xf32>
      %c0_12 = arith.constant 0 : index
      %c0_13 = arith.constant 0 : index
      %13 = vector.load %arg5[%c0_12, %c0_13] : memref<1x128xf32, #tpu.memory_space<vmem>>, vector<1x128xf32>
      %14 = vector.broadcast %13 : vector<1x128xf32> to vector<128x128xf32>
      %15 = arith.addf %12, %14 : vector<128x128xf32>
      %cst_14 = arith.constant 0.000000e+00 : f32
      %16 = vector.broadcast %cst_14 : f32 to vector<128x128xf32>
      %17 = arith.maximumf %15, %16 : vector<128x128xf32>
      %18 = arith.truncf %17 : vector<128x128xf32> to vector<128x128xbf16>
      %c0_15 = arith.constant 0 : index
      %c0_16 = arith.constant 0 : index
      %19 = vector.load %arg6[%c0_15, %c0_16] : memref<128x128xbf16, #tpu.memory_space<vmem>>, vector<128x128xbf16>
      tpu.vector_store %arg6[%c0_15, %c0_16], %18 {strides = array<i32>} : memref<128x128xbf16, #tpu.memory_space<vmem>>, vector<128x128xbf16>,
    } else {
    }
    return
  }
  func.func @transform_0(%arg0: i32, %arg1: i32, %arg2: i32) -> (i32, i32) {
    %c0_i32 = arith.constant 0 : i32
    return %arg0, %arg2 : i32, i32
  }
  func.func @transform_1(%arg0: i32, %arg1: i32, %arg2: i32) -> (i32, i32) {
    %c0_i32 = arith.constant 0 : i32
    return %arg2, %arg1 : i32, i32
  }
  func.func @transform_2(%arg0: i32, %arg1: i32, %arg2: i32) -> (i32, i32) {
    %c0_i32 = arith.constant 0 : i32
    %c0_i32_0 = arith.constant 0 : i32
    return %c0_i32, %arg1 : i32, i32
  }
  func.func @transform_3(%arg0: i32, %arg1: i32, %arg2: i32) -> (i32, i32) {
    %c0_i32 = arith.constant 0 : i32
    return %arg0, %arg1 : i32, i32
  }
}

module attributes {stable_mosaic.version = 11 : i64} {
  func.func @_conv_mm_kernel(%arg0: i32, %arg1: i32, %arg2: i32, %arg3: memref<32x256xbf16, #tpu.memory_space<vmem>>, %arg4: memref<256x128xbf16, #tpu.memory_space<vmem>>, %arg5: memref<1x128xf32, #tpu.memory_space<vmem>>, %arg6: memref<32x128xbf16, #tpu.memory_space<vmem>>, %arg7: memref<32x128xf32, #tpu.memory_space<vmem>>) attributes {dimension_semantics = [#tpu.dimension_semantics<parallel>, #tpu.dimension_semantics<parallel>, #tpu.dimension_semantics<arbitrary>], iteration_bounds = array<i64: 1, 1, 1>, scalar_prefetch = 0 : i64, scratch_operands = 1 : i64, tpu.core_type = #tpu.core_type<tc>, window_params = [{transform_indices = @transform_0, window_bounds = array<i64: 32, 256>}, {transform_indices = @transform_1, window_bounds = array<i64: 256, 128>}, {transform_indices = @transform_2, window_bounds = array<i64: 1, 128>}, {transform_indices = @transform_3, window_bounds = array<i64: 32, 128>}]} {
    %c0_i32 = arith.constant 0 : i32
    %0 = arith.cmpi eq, %arg2, %c0_i32 : i32
    %1 = arith.extui %0 : i1 to i32
    %c0_i32_0 = arith.constant 0 : i32
    %2 = arith.cmpi ne, %1, %c0_i32_0 : i32
    scf.if %2 {
      %cst_10 = arith.constant 0.000000e+00 : f32
      %12 = vector.broadcast %cst_10 : f32 to vector<32x128xf32>
      %c0_11 = arith.constant 0 : index
      %c0_12 = arith.constant 0 : index
      %13 = vector.load %arg7[%c0_11, %c0_12] : memref<32x128xf32, #tpu.memory_space<vmem>>, vector<32x128xf32>
      tpu.vector_store %arg7[%c0_11, %c0_12], %12 {strides = array<i32>} : memref<32x128xf32, #tpu.memory_space<vmem>>, vector<32x128xf32>,
    } else {
    }
    %c0 = arith.constant 0 : index
    %c0_1 = arith.constant 0 : index
    %3 = vector.load %arg7[%c0, %c0_1] : memref<32x128xf32, #tpu.memory_space<vmem>>, vector<32x128xf32>
    %c0_2 = arith.constant 0 : index
    %c0_3 = arith.constant 0 : index
    %4 = vector.load %arg3[%c0_2, %c0_3] : memref<32x256xbf16, #tpu.memory_space<vmem>>, vector<32x256xbf16>
    %c0_4 = arith.constant 0 : index
    %c0_5 = arith.constant 0 : index
    %5 = vector.load %arg4[%c0_4, %c0_5] : memref<256x128xbf16, #tpu.memory_space<vmem>>, vector<256x128xbf16>
    %cst = arith.constant dense<0.000000e+00> : vector<32x128xf32>
    %6 = tpu.matmul %4, %5, %cst {dimension_numbers = #tpu.dot_dimension_numbers<[1], [0], [0], [1], [0, 0, 1, 1], [], []>} : vector<32x256xbf16>, vector<256x128xbf16>, vector<32x128xf32> -> vector<32x128xf32>
    %7 = arith.addf %3, %6 : vector<32x128xf32>
    %c0_6 = arith.constant 0 : index
    %c0_7 = arith.constant 0 : index
    %8 = vector.load %arg7[%c0_6, %c0_7] : memref<32x128xf32, #tpu.memory_space<vmem>>, vector<32x128xf32>
    tpu.vector_store %arg7[%c0_6, %c0_7], %7 {strides = array<i32>} : memref<32x128xf32, #tpu.memory_space<vmem>>, vector<32x128xf32>,
    %c0_i32_8 = arith.constant 0 : i32
    %9 = arith.cmpi eq, %arg2, %c0_i32_8 : i32
    %10 = arith.extui %9 : i1 to i32
    %c0_i32_9 = arith.constant 0 : i32
    %11 = arith.cmpi ne, %10, %c0_i32_9 : i32
    scf.if %11 {
      %c0_10 = arith.constant 0 : index
      %c0_11 = arith.constant 0 : index
      %12 = vector.load %arg7[%c0_10, %c0_11] : memref<32x128xf32, #tpu.memory_space<vmem>>, vector<32x128xf32>
      %c0_12 = arith.constant 0 : index
      %c0_13 = arith.constant 0 : index
      %13 = vector.load %arg5[%c0_12, %c0_13] : memref<1x128xf32, #tpu.memory_space<vmem>>, vector<1x128xf32>
      %14 = vector.broadcast %13 : vector<1x128xf32> to vector<32x128xf32>
      %15 = arith.addf %12, %14 : vector<32x128xf32>
      %cst_14 = arith.constant 0.000000e+00 : f32
      %16 = vector.broadcast %cst_14 : f32 to vector<32x128xf32>
      %17 = arith.maximumf %15, %16 : vector<32x128xf32>
      %18 = arith.truncf %17 : vector<32x128xf32> to vector<32x128xbf16>
      %c0_15 = arith.constant 0 : index
      %c0_16 = arith.constant 0 : index
      %19 = vector.load %arg6[%c0_15, %c0_16] : memref<32x128xbf16, #tpu.memory_space<vmem>>, vector<32x128xbf16>
      tpu.vector_store %arg6[%c0_15, %c0_16], %18 {strides = array<i32>} : memref<32x128xbf16, #tpu.memory_space<vmem>>, vector<32x128xbf16>,
    } else {
    }
    return
  }
  func.func @transform_0(%arg0: i32, %arg1: i32, %arg2: i32) -> (i32, i32) {
    %c0_i32 = arith.constant 0 : i32
    return %arg0, %arg2 : i32, i32
  }
  func.func @transform_1(%arg0: i32, %arg1: i32, %arg2: i32) -> (i32, i32) {
    %c0_i32 = arith.constant 0 : i32
    return %arg2, %arg1 : i32, i32
  }
  func.func @transform_2(%arg0: i32, %arg1: i32, %arg2: i32) -> (i32, i32) {
    %c0_i32 = arith.constant 0 : i32
    %c0_i32_0 = arith.constant 0 : i32
    return %c0_i32, %arg1 : i32, i32
  }
  func.func @transform_3(%arg0: i32, %arg1: i32, %arg2: i32) -> (i32, i32) {
    %c0_i32 = arith.constant 0 : i32
    return %arg0, %arg1 : i32, i32
  }
}

module attributes {stable_mosaic.version = 11 : i64} {
  func.func @_conv_mm_kernel(%arg0: i32, %arg1: i32, %arg2: i32, %arg3: memref<32x384xbf16, #tpu.memory_space<vmem>>, %arg4: memref<384x128xbf16, #tpu.memory_space<vmem>>, %arg5: memref<1x128xf32, #tpu.memory_space<vmem>>, %arg6: memref<32x128xbf16, #tpu.memory_space<vmem>>, %arg7: memref<32x128xf32, #tpu.memory_space<vmem>>) attributes {dimension_semantics = [#tpu.dimension_semantics<parallel>, #tpu.dimension_semantics<parallel>, #tpu.dimension_semantics<arbitrary>], iteration_bounds = array<i64: 1, 1, 1>, scalar_prefetch = 0 : i64, scratch_operands = 1 : i64, tpu.core_type = #tpu.core_type<tc>, window_params = [{transform_indices = @transform_0, window_bounds = array<i64: 32, 384>}, {transform_indices = @transform_1, window_bounds = array<i64: 384, 128>}, {transform_indices = @transform_2, window_bounds = array<i64: 1, 128>}, {transform_indices = @transform_3, window_bounds = array<i64: 32, 128>}]} {
    %c0_i32 = arith.constant 0 : i32
    %0 = arith.cmpi eq, %arg2, %c0_i32 : i32
    %1 = arith.extui %0 : i1 to i32
    %c0_i32_0 = arith.constant 0 : i32
    %2 = arith.cmpi ne, %1, %c0_i32_0 : i32
    scf.if %2 {
      %cst_10 = arith.constant 0.000000e+00 : f32
      %12 = vector.broadcast %cst_10 : f32 to vector<32x128xf32>
      %c0_11 = arith.constant 0 : index
      %c0_12 = arith.constant 0 : index
      %13 = vector.load %arg7[%c0_11, %c0_12] : memref<32x128xf32, #tpu.memory_space<vmem>>, vector<32x128xf32>
      tpu.vector_store %arg7[%c0_11, %c0_12], %12 {strides = array<i32>} : memref<32x128xf32, #tpu.memory_space<vmem>>, vector<32x128xf32>,
    } else {
    }
    %c0 = arith.constant 0 : index
    %c0_1 = arith.constant 0 : index
    %3 = vector.load %arg7[%c0, %c0_1] : memref<32x128xf32, #tpu.memory_space<vmem>>, vector<32x128xf32>
    %c0_2 = arith.constant 0 : index
    %c0_3 = arith.constant 0 : index
    %4 = vector.load %arg3[%c0_2, %c0_3] : memref<32x384xbf16, #tpu.memory_space<vmem>>, vector<32x384xbf16>
    %c0_4 = arith.constant 0 : index
    %c0_5 = arith.constant 0 : index
    %5 = vector.load %arg4[%c0_4, %c0_5] : memref<384x128xbf16, #tpu.memory_space<vmem>>, vector<384x128xbf16>
    %cst = arith.constant dense<0.000000e+00> : vector<32x128xf32>
    %6 = tpu.matmul %4, %5, %cst {dimension_numbers = #tpu.dot_dimension_numbers<[1], [0], [0], [1], [0, 0, 1, 1], [], []>} : vector<32x384xbf16>, vector<384x128xbf16>, vector<32x128xf32> -> vector<32x128xf32>
    %7 = arith.addf %3, %6 : vector<32x128xf32>
    %c0_6 = arith.constant 0 : index
    %c0_7 = arith.constant 0 : index
    %8 = vector.load %arg7[%c0_6, %c0_7] : memref<32x128xf32, #tpu.memory_space<vmem>>, vector<32x128xf32>
    tpu.vector_store %arg7[%c0_6, %c0_7], %7 {strides = array<i32>} : memref<32x128xf32, #tpu.memory_space<vmem>>, vector<32x128xf32>,
    %c0_i32_8 = arith.constant 0 : i32
    %9 = arith.cmpi eq, %arg2, %c0_i32_8 : i32
    %10 = arith.extui %9 : i1 to i32
    %c0_i32_9 = arith.constant 0 : i32
    %11 = arith.cmpi ne, %10, %c0_i32_9 : i32
    scf.if %11 {
      %c0_10 = arith.constant 0 : index
      %c0_11 = arith.constant 0 : index
      %12 = vector.load %arg7[%c0_10, %c0_11] : memref<32x128xf32, #tpu.memory_space<vmem>>, vector<32x128xf32>
      %c0_12 = arith.constant 0 : index
      %c0_13 = arith.constant 0 : index
      %13 = vector.load %arg5[%c0_12, %c0_13] : memref<1x128xf32, #tpu.memory_space<vmem>>, vector<1x128xf32>
      %14 = vector.broadcast %13 : vector<1x128xf32> to vector<32x128xf32>
      %15 = arith.addf %12, %14 : vector<32x128xf32>
      %16 = arith.truncf %15 : vector<32x128xf32> to vector<32x128xbf16>
      %c0_14 = arith.constant 0 : index
      %c0_15 = arith.constant 0 : index
      %17 = vector.load %arg6[%c0_14, %c0_15] : memref<32x128xbf16, #tpu.memory_space<vmem>>, vector<32x128xbf16>
      tpu.vector_store %arg6[%c0_14, %c0_15], %16 {strides = array<i32>} : memref<32x128xbf16, #tpu.memory_space<vmem>>, vector<32x128xbf16>,
    } else {
    }
    return
  }
  func.func @transform_0(%arg0: i32, %arg1: i32, %arg2: i32) -> (i32, i32) {
    %c0_i32 = arith.constant 0 : i32
    return %arg0, %arg2 : i32, i32
  }
  func.func @transform_1(%arg0: i32, %arg1: i32, %arg2: i32) -> (i32, i32) {
    %c0_i32 = arith.constant 0 : i32
    return %arg2, %arg1 : i32, i32
  }
  func.func @transform_2(%arg0: i32, %arg1: i32, %arg2: i32) -> (i32, i32) {
    %c0_i32 = arith.constant 0 : i32
    %c0_i32_0 = arith.constant 0 : i32
    return %c0_i32, %arg1 : i32, i32
  }
  func.func @transform_3(%arg0: i32, %arg1: i32, %arg2: i32) -> (i32, i32) {
    %c0_i32 = arith.constant 0 : i32
    return %arg0, %arg1 : i32, i32
  }
}

module attributes {stable_mosaic.version = 11 : i64} {
  func.func @_res_layer_kernel(%arg0: i32, %arg1: i32, %arg2: memref<32x384xbf16, #tpu.memory_space<vmem>>, %arg3: memref<384x128xbf16, #tpu.memory_space<vmem>>, %arg4: memref<128x128xbf16, #tpu.memory_space<vmem>>, %arg5: memref<32x128xbf16, #tpu.memory_space<vmem>>, %arg6: memref<32x128xbf16, #tpu.memory_space<vmem>>, %arg7: memref<32x128xf32, #tpu.memory_space<vmem>>) attributes {dimension_semantics = [#tpu.dimension_semantics<parallel>, #tpu.dimension_semantics<arbitrary>], iteration_bounds = array<i64: 1, 1>, scalar_prefetch = 0 : i64, scratch_operands = 1 : i64, tpu.core_type = #tpu.core_type<tc>, window_params = [{transform_indices = @transform_0, window_bounds = array<i64: 32, 384>}, {transform_indices = @transform_1, window_bounds = array<i64: 384, 128>}, {pipeline_mode = #tpu.pipeline_mode<synchronous>, transform_indices = @transform_2, window_bounds = array<i64: 128, 128>}, {transform_indices = @transform_3, window_bounds = array<i64: 32, 128>}, {transform_indices = @transform_4, window_bounds = array<i64: 32, 128>}]} {
    %c0_i32 = arith.constant 0 : i32
    %0 = arith.cmpi eq, %arg1, %c0_i32 : i32
    %1 = arith.extui %0 : i1 to i32
    %c0_i32_0 = arith.constant 0 : i32
    %2 = arith.cmpi ne, %1, %c0_i32_0 : i32
    scf.if %2 {
      %cst_11 = arith.constant 0.000000e+00 : f32
      %14 = vector.broadcast %cst_11 : f32 to vector<32x128xf32>
      %c0_12 = arith.constant 0 : index
      %c0_13 = arith.constant 0 : index
      %15 = vector.load %arg7[%c0_12, %c0_13] : memref<32x128xf32, #tpu.memory_space<vmem>>, vector<32x128xf32>
      tpu.vector_store %arg7[%c0_12, %c0_13], %14 {strides = array<i32>} : memref<32x128xf32, #tpu.memory_space<vmem>>, vector<32x128xf32>,
    } else {
    }
    %c0 = arith.constant 0 : index
    %c0_1 = arith.constant 0 : index
    %3 = vector.load %arg2[%c0, %c0_1] : memref<32x384xbf16, #tpu.memory_space<vmem>>, vector<32x384xbf16>
    %cst = arith.constant 0.000000e+00 : bf16
    %4 = vector.broadcast %cst : bf16 to vector<32x384xbf16>
    %5 = arith.maximumf %3, %4 : vector<32x384xbf16>
    %c0_2 = arith.constant 0 : index
    %c0_3 = arith.constant 0 : index
    %6 = vector.load %arg7[%c0_2, %c0_3] : memref<32x128xf32, #tpu.memory_space<vmem>>, vector<32x128xf32>
    %c0_4 = arith.constant 0 : index
    %c0_5 = arith.constant 0 : index
    %7 = vector.load %arg3[%c0_4, %c0_5] : memref<384x128xbf16, #tpu.memory_space<vmem>>, vector<384x128xbf16>
    %cst_6 = arith.constant dense<0.000000e+00> : vector<32x128xf32>
    %8 = tpu.matmul %5, %7, %cst_6 {dimension_numbers = #tpu.dot_dimension_numbers<[1], [0], [0], [1], [0, 0, 1, 1], [], []>} : vector<32x384xbf16>, vector<384x128xbf16>, vector<32x128xf32> -> vector<32x128xf32>
    %9 = arith.addf %6, %8 : vector<32x128xf32>
    %c0_7 = arith.constant 0 : index
    %c0_8 = arith.constant 0 : index
    %10 = vector.load %arg7[%c0_7, %c0_8] : memref<32x128xf32, #tpu.memory_space<vmem>>, vector<32x128xf32>
    tpu.vector_store %arg7[%c0_7, %c0_8], %9 {strides = array<i32>} : memref<32x128xf32, #tpu.memory_space<vmem>>, vector<32x128xf32>,
    %c0_i32_9 = arith.constant 0 : i32
    %11 = arith.cmpi eq, %arg1, %c0_i32_9 : i32
    %12 = arith.extui %11 : i1 to i32
    %c0_i32_10 = arith.constant 0 : i32
    %13 = arith.cmpi ne, %12, %c0_i32_10 : i32
    scf.if %13 {
      %c0_11 = arith.constant 0 : index
      %c0_12 = arith.constant 0 : index
      %14 = vector.load %arg7[%c0_11, %c0_12] : memref<32x128xf32, #tpu.memory_space<vmem>>, vector<32x128xf32>
      %cst_13 = arith.constant 0.000000e+00 : f32
      %15 = vector.broadcast %cst_13 : f32 to vector<32x128xf32>
      %16 = arith.maximumf %14, %15 : vector<32x128xf32>
      %17 = arith.truncf %16 : vector<32x128xf32> to vector<32x128xbf16>
      %c0_14 = arith.constant 0 : index
      %c0_15 = arith.constant 0 : index
      %18 = vector.load %arg4[%c0_14, %c0_15] : memref<128x128xbf16, #tpu.memory_space<vmem>>, vector<128x128xbf16>
      %cst_16 = arith.constant dense<0.000000e+00> : vector<32x128xf32>
      %19 = tpu.matmul %17, %18, %cst_16 {dimension_numbers = #tpu.dot_dimension_numbers<[1], [0], [0], [1], [0, 0, 1, 1], [], []>} : vector<32x128xbf16>, vector<128x128xbf16>, vector<32x128xf32> -> vector<32x128xf32>
      %c0_17 = arith.constant 0 : index
      %c0_18 = arith.constant 0 : index
      %20 = vector.load %arg5[%c0_17, %c0_18] : memref<32x128xbf16, #tpu.memory_space<vmem>>, vector<32x128xbf16>
      %21 = arith.extf %20 : vector<32x128xbf16> to vector<32x128xf32>
      %22 = arith.addf %19, %21 : vector<32x128xf32>
      %cst_19 = arith.constant 0.000000e+00 : f32
      %23 = vector.broadcast %cst_19 : f32 to vector<32x128xf32>
      %24 = arith.maximumf %22, %23 : vector<32x128xf32>
      %25 = arith.truncf %24 : vector<32x128xf32> to vector<32x128xbf16>
      %c0_20 = arith.constant 0 : index
      %c0_21 = arith.constant 0 : index
      %26 = vector.load %arg6[%c0_20, %c0_21] : memref<32x128xbf16, #tpu.memory_space<vmem>>, vector<32x128xbf16>
      tpu.vector_store %arg6[%c0_20, %c0_21], %25 {strides = array<i32>} : memref<32x128xbf16, #tpu.memory_space<vmem>>, vector<32x128xbf16>,
    } else {
    }
    return
  }
  func.func @transform_0(%arg0: i32, %arg1: i32) -> (i32, i32) {
    %c0_i32 = arith.constant 0 : i32
    return %arg0, %arg1 : i32, i32
  }
  func.func @transform_1(%arg0: i32, %arg1: i32) -> (i32, i32) {
    %c0_i32 = arith.constant 0 : i32
    %c0_i32_0 = arith.constant 0 : i32
    return %arg1, %c0_i32 : i32, i32
  }
  func.func @transform_2(%arg0: i32, %arg1: i32) -> (i32, i32) {
    %c0_i32 = arith.constant 0 : i32
    %c0_i32_0 = arith.constant 0 : i32
    %c0_i32_1 = arith.constant 0 : i32
    return %c0_i32, %c0_i32_0 : i32, i32
  }
  func.func @transform_3(%arg0: i32, %arg1: i32) -> (i32, i32) {
    %c0_i32 = arith.constant 0 : i32
    %c0_i32_0 = arith.constant 0 : i32
    return %arg0, %c0_i32 : i32, i32
  }
  func.func @transform_4(%arg0: i32, %arg1: i32) -> (i32, i32) {
    %c0_i32 = arith.constant 0 : i32
    %c0_i32_0 = arith.constant 0 : i32
    return %arg0, %c0_i32 : i32, i32
  }
}

module attributes {stable_mosaic.version = 11 : i64} {
  func.func @_res_layer_kernel(%arg0: i32, %arg1: i32, %arg2: memref<32x384xbf16, #tpu.memory_space<vmem>>, %arg3: memref<384x128xbf16, #tpu.memory_space<vmem>>, %arg4: memref<128x128xbf16, #tpu.memory_space<vmem>>, %arg5: memref<32x128xbf16, #tpu.memory_space<vmem>>, %arg6: memref<32x128xbf16, #tpu.memory_space<vmem>>, %arg7: memref<32x128xf32, #tpu.memory_space<vmem>>) attributes {dimension_semantics = [#tpu.dimension_semantics<parallel>, #tpu.dimension_semantics<arbitrary>], iteration_bounds = array<i64: 1, 1>, scalar_prefetch = 0 : i64, scratch_operands = 1 : i64, tpu.core_type = #tpu.core_type<tc>, window_params = [{transform_indices = @transform_0, window_bounds = array<i64: 32, 384>}, {transform_indices = @transform_1, window_bounds = array<i64: 384, 128>}, {pipeline_mode = #tpu.pipeline_mode<synchronous>, transform_indices = @transform_2, window_bounds = array<i64: 128, 128>}, {transform_indices = @transform_3, window_bounds = array<i64: 32, 128>}, {transform_indices = @transform_4, window_bounds = array<i64: 32, 128>}]} {
    %c0_i32 = arith.constant 0 : i32
    %0 = arith.cmpi eq, %arg1, %c0_i32 : i32
    %1 = arith.extui %0 : i1 to i32
    %c0_i32_0 = arith.constant 0 : i32
    %2 = arith.cmpi ne, %1, %c0_i32_0 : i32
    scf.if %2 {
      %cst_11 = arith.constant 0.000000e+00 : f32
      %14 = vector.broadcast %cst_11 : f32 to vector<32x128xf32>
      %c0_12 = arith.constant 0 : index
      %c0_13 = arith.constant 0 : index
      %15 = vector.load %arg7[%c0_12, %c0_13] : memref<32x128xf32, #tpu.memory_space<vmem>>, vector<32x128xf32>
      tpu.vector_store %arg7[%c0_12, %c0_13], %14 {strides = array<i32>} : memref<32x128xf32, #tpu.memory_space<vmem>>, vector<32x128xf32>,
    } else {
    }
    %c0 = arith.constant 0 : index
    %c0_1 = arith.constant 0 : index
    %3 = vector.load %arg2[%c0, %c0_1] : memref<32x384xbf16, #tpu.memory_space<vmem>>, vector<32x384xbf16>
    %cst = arith.constant 0.000000e+00 : bf16
    %4 = vector.broadcast %cst : bf16 to vector<32x384xbf16>
    %5 = arith.maximumf %3, %4 : vector<32x384xbf16>
    %c0_2 = arith.constant 0 : index
    %c0_3 = arith.constant 0 : index
    %6 = vector.load %arg7[%c0_2, %c0_3] : memref<32x128xf32, #tpu.memory_space<vmem>>, vector<32x128xf32>
    %c0_4 = arith.constant 0 : index
    %c0_5 = arith.constant 0 : index
    %7 = vector.load %arg3[%c0_4, %c0_5] : memref<384x128xbf16, #tpu.memory_space<vmem>>, vector<384x128xbf16>
    %cst_6 = arith.constant dense<0.000000e+00> : vector<32x128xf32>
    %8 = tpu.matmul %5, %7, %cst_6 {dimension_numbers = #tpu.dot_dimension_numbers<[1], [0], [0], [1], [0, 0, 1, 1], [], []>} : vector<32x384xbf16>, vector<384x128xbf16>, vector<32x128xf32> -> vector<32x128xf32>
    %9 = arith.addf %6, %8 : vector<32x128xf32>
    %c0_7 = arith.constant 0 : index
    %c0_8 = arith.constant 0 : index
    %10 = vector.load %arg7[%c0_7, %c0_8] : memref<32x128xf32, #tpu.memory_space<vmem>>, vector<32x128xf32>
    tpu.vector_store %arg7[%c0_7, %c0_8], %9 {strides = array<i32>} : memref<32x128xf32, #tpu.memory_space<vmem>>, vector<32x128xf32>,
    %c0_i32_9 = arith.constant 0 : i32
    %11 = arith.cmpi eq, %arg1, %c0_i32_9 : i32
    %12 = arith.extui %11 : i1 to i32
    %c0_i32_10 = arith.constant 0 : i32
    %13 = arith.cmpi ne, %12, %c0_i32_10 : i32
    scf.if %13 {
      %c0_11 = arith.constant 0 : index
      %c0_12 = arith.constant 0 : index
      %14 = vector.load %arg7[%c0_11, %c0_12] : memref<32x128xf32, #tpu.memory_space<vmem>>, vector<32x128xf32>
      %cst_13 = arith.constant 0.000000e+00 : f32
      %15 = vector.broadcast %cst_13 : f32 to vector<32x128xf32>
      %16 = arith.maximumf %14, %15 : vector<32x128xf32>
      %17 = arith.truncf %16 : vector<32x128xf32> to vector<32x128xbf16>
      %c0_14 = arith.constant 0 : index
      %c0_15 = arith.constant 0 : index
      %18 = vector.load %arg4[%c0_14, %c0_15] : memref<128x128xbf16, #tpu.memory_space<vmem>>, vector<128x128xbf16>
      %cst_16 = arith.constant dense<0.000000e+00> : vector<32x128xf32>
      %19 = tpu.matmul %17, %18, %cst_16 {dimension_numbers = #tpu.dot_dimension_numbers<[1], [0], [0], [1], [0, 0, 1, 1], [], []>} : vector<32x128xbf16>, vector<128x128xbf16>, vector<32x128xf32> -> vector<32x128xf32>
      %c0_17 = arith.constant 0 : index
      %c0_18 = arith.constant 0 : index
      %20 = vector.load %arg5[%c0_17, %c0_18] : memref<32x128xbf16, #tpu.memory_space<vmem>>, vector<32x128xbf16>
      %21 = arith.extf %20 : vector<32x128xbf16> to vector<32x128xf32>
      %22 = arith.addf %19, %21 : vector<32x128xf32>
      %23 = arith.truncf %22 : vector<32x128xf32> to vector<32x128xbf16>
      %c0_19 = arith.constant 0 : index
      %c0_20 = arith.constant 0 : index
      %24 = vector.load %arg6[%c0_19, %c0_20] : memref<32x128xbf16, #tpu.memory_space<vmem>>, vector<32x128xbf16>
      tpu.vector_store %arg6[%c0_19, %c0_20], %23 {strides = array<i32>} : memref<32x128xbf16, #tpu.memory_space<vmem>>, vector<32x128xbf16>,
    } else {
    }
    return
  }
  func.func @transform_0(%arg0: i32, %arg1: i32) -> (i32, i32) {
    %c0_i32 = arith.constant 0 : i32
    return %arg0, %arg1 : i32, i32
  }
  func.func @transform_1(%arg0: i32, %arg1: i32) -> (i32, i32) {
    %c0_i32 = arith.constant 0 : i32
    %c0_i32_0 = arith.constant 0 : i32
    return %arg1, %c0_i32 : i32, i32
  }
  func.func @transform_2(%arg0: i32, %arg1: i32) -> (i32, i32) {
    %c0_i32 = arith.constant 0 : i32
    %c0_i32_0 = arith.constant 0 : i32
    %c0_i32_1 = arith.constant 0 : i32
    return %c0_i32, %c0_i32_0 : i32, i32
  }
  func.func @transform_3(%arg0: i32, %arg1: i32) -> (i32, i32) {
    %c0_i32 = arith.constant 0 : i32
    %c0_i32_0 = arith.constant 0 : i32
    return %arg0, %c0_i32 : i32, i32
  }
  func.func @transform_4(%arg0: i32, %arg1: i32) -> (i32, i32) {
    %c0_i32 = arith.constant 0 : i32
    %c0_i32_0 = arith.constant 0 : i32
    return %arg0, %c0_i32 : i32, i32
  }
}

</mosaic_0001>

<bundles_post_ra>
// kernel: encoder_forward.5
= control target key start
LH: loop header
LB: loop body
LE: loop exit
PB: predicated region body
PF: predicated region fallthrough
CT: control target
= control target key end

     0   :  { %s721_s1 = inlined_call_operand.vmem [shape: bf16[128,128], index: 1, kind: input, shape index: {}]   ;;  %s722_s0 = inlined_call_operand.vmem [shape: bf16[128,128], index: 0, kind: input, shape index: {}]   ;;  %s723_s2 = inlined_call_operand.vmem [shape: f32[1,128], index: 2, kind: input, shape index: {}]   ;;  %s724_s3 = inlined_call_operand.vmem [shape: bf16[128,128], index: 3, kind: output, shape index: {}]  }
   0x1   :  { %v610_v0 = vld [vmem:[%s721_s1] sm:$0xff]   ;;  %v611_v1 = vld [vmem:[%s721_s1 + $0x8] sm:$0xff]   ;;  %v612_v2 = vld [vmem:[%s721_s1 + $0x10] sm:$0xff]  }
   0x2   :  { %562 = vmatprep.subr.bf16.mxu0 %v610_v0  ;;  %594 = vmatprep.subr.bf16.mxu1 %v610_v0  ;;  %v613_v3 = vld [vmem:[%s721_s1 + $0x18] sm:$0xff]   ;;  %v618_v4 = vld [vmem:[%s722_s0] sm:$0xff]   ;;  %v615_v7 = vld [vmem:[%s721_s1 + $0x28] sm:$0xff]  }
   0x3   :  { %563 = vmatpush3.bf16.msra.mxu0 %v610_v0  ;;  %602 = vmatpush3.bf16.msra.mxu1 %v610_v0  ;;  %v619_v5 = vld [vmem:[%s722_s0 + $0x20] sm:$0xff]   ;;  %v616_v8 = vld [vmem:[%s721_s1 + $0x30] sm:$0xff]   ;;  %v617_v9 = vld [vmem:[%s721_s1 + $0x38] sm:$0xff]  }
   0x4   :  { %564 = vmatprep.subr.bf16.mxu0 %v611_v1  ;;  %595 = vmatprep.subr.bf16.mxu1 %v611_v1  ;;  %v614_v6 = vld [vmem:[%s721_s1 + $0x20] sm:$0xff]   ;;  %v620_v10 = vld [vmem:[%s722_s0 + $0x8] sm:$0xff]   ;;  %v622_v12 = vld [vmem:[%s722_s0 + $0x10] sm:$0xff]  }
   0x5   :  { %578 = vmatprep.mubr.bf16.mxu0 %v618_v4  ;;  %586 = vmatprep.mubr.bf16.mxu1 %v619_v5  ;;  %v621_v11 = vld [vmem:[%s722_s0 + $0x28] sm:$0xff]   ;;  %v623_v13 = vld [vmem:[%s722_s0 + $0x30] sm:$0xff]   ;;  %v624_v14 = vld [vmem:[%s722_s0 + $0x18] sm:$0xff]  }
   0x6   :  { %v625_v15 = vld [vmem:[%s722_s0 + $0x38] sm:$0xff]   ;;  %v466_v16 = vld [vmem:[%s723_s2] ss:$0 sm:$0xff] }
   0x7   :  { %565 = vmatpush3.bf16.msra.mxu0 %v611_v1  ;;  %603 = vmatpush3.bf16.msra.mxu1 %v611_v1 }
   0x8   :  { %566 = vmatprep.subr.bf16.mxu0 %v612_v2  ;;  %596 = vmatprep.subr.bf16.mxu1 %v612_v2 }
   0xb   :  { %567 = vmatpush3.bf16.msra.mxu0 %v612_v2  ;;  %604 = vmatpush3.bf16.msra.mxu1 %v612_v2 }
   0xc   :  { %568 = vmatprep.subr.bf16.mxu0 %v613_v3  ;;  %597 = vmatprep.subr.bf16.mxu1 %v613_v3 }
   0xf   :  { %569 = vmatpush3.bf16.msra.mxu0 %v613_v3  ;;  %605 = vmatpush3.bf16.msra.mxu1 %v613_v3 }
  0x10   :  { %570 = vmatprep.subr.bf16.mxu0 %v614_v6  ;;  %598 = vmatprep.subr.bf16.mxu1 %v614_v6 }
  0x13   :  { %571 = vmatpush3.bf16.msra.mxu0 %v614_v6  ;;  %606 = vmatpush3.bf16.msra.mxu1 %v614_v6 }
  0x14   :  { %572 = vmatprep.subr.bf16.mxu0 %v615_v7  ;;  %599 = vmatprep.subr.bf16.mxu1 %v615_v7 }
  0x17   :  { %573 = vmatpush3.bf16.msra.mxu0 %v615_v7  ;;  %607 = vmatpush3.bf16.msra.mxu1 %v615_v7 }
  0x18   :  { %574 = vmatprep.subr.bf16.mxu0 %v616_v8  ;;  %600 = vmatprep.subr.bf16.mxu1 %v616_v8 }
  0x1b   :  { %575 = vmatpush3.bf16.msra.mxu0 %v616_v8  ;;  %608 = vmatpush3.bf16.msra.mxu1 %v616_v8 }
  0x1c   :  { %576 = vmatprep.subr.bf16.mxu0 %v617_v9  ;;  %601 = vmatprep.subr.bf16.mxu1 %v617_v9 }
  0x1f   :  { %577 = vmatpush3.bf16.msra.mxu0 %v617_v9  ;;  %609 = vmatpush3.bf16.msra.mxu1 %v617_v9 }
  0x22   :  { %579 = vmatmul.mubr.bf16.vlgmr.msra.gmra.mrb[0].mxu0 %v620_v10  ;;  %587 = vmatmul.mubr.bf16.vlgmr.msra.gmra.mrb[0].mxu1 %v621_v11 }
  0x23   :  { %582 = vmatprep.mubr.bf16.mxu0 %v622_v12  ;;  %590 = vmatprep.mubr.bf16.mxu1 %v623_v13 }
  0x2a   :  { %583 = vmatmul.mubr.bf16.gmra.mrb[4].mxu0 %v624_v14  ;;  %591 = vmatmul.mubr.bf16.gmra.mrb[4].mxu1 %v625_v15 }
  0xf5   :  { %v580_v17 = vpop.f32.mrb[0].mxu0  ;;  %v588_v18 = vpop.f32.mrb[0].mxu1 }
  0xf6   :  { %v336_v19 = vadd.f32 %v580_v17, %v466_v16  ;;  %v344_v20 = vadd.f32 %v588_v18, %v466_v16  ;;  %v213_v21 = vpop.f32.mrb[1].mxu0  ;;  %v245_v22 = vpop.f32.mrb[1].mxu1 }
  0xf7   :  { %v334_v23 = vadd.f32 %v466_v16, %v213_v21  ;;  %v342_v24 = vadd.f32 %v466_v16, %v245_v22  ;;  %v581_v25 = vpop.f32.mrb[2].mxu0  ;;  %v589_v26 = vpop.f32.mrb[2].mxu1 }
  0xf8   :  { %v337_v27 = vadd.f32 %v581_v25, %v466_v16  ;;  %v345_v28 = vadd.f32 %v589_v26, %v466_v16  ;;  %v216_v29 = vpop.f32.mrb[3].mxu0  ;;  %v248_v30 = vpop.f32.mrb[3].mxu1  ;;  %v352_v33 = vmax.f32 %v336_v19, 0.0  ;;  %v360_v34 = vmax.f32 %v344_v20, 0.0 }
  0xf9   :  { %v335_v31 = vadd.f32 %v466_v16, %v216_v29  ;;  %v343_v32 = vadd.f32 %v466_v16, %v248_v30  ;;  %v350_v37 = vmax.f32 %v334_v23, 0.0  ;;  %v358_v38 = vmax.f32 %v342_v24, 0.0 }
  0xfa   :  { %v353_v35 = vmax.f32 %v337_v27, 0.0  ;;  %v361_v36 = vmax.f32 %v345_v28, 0.0 }
  0xfb   :  { %v351_v39 = vmax.f32 %v335_v31, 0.0  ;;  %v359_v40 = vmax.f32 %v343_v32, 0.0 }
  0xfc   :  { %v507_v41 = vpack.c.bf16 %v353_v35, %v352_v33  ;;  %v527_v42 = vpack.c.bf16 %v361_v36, %v360_v34 }
  0xfd   :  { %v502_v43 = vpack.c.bf16 %v351_v39, %v350_v37  ;;  %v522_v44 = vpack.c.bf16 %v359_v40, %v358_v38  ;;  %v584_v45 = vpop.f32.mrb[4].mxu0  ;;  %v592_v46 = vpop.f32.mrb[4].mxu1 }
  0xfe   :  { %539 = vst [vmem:[%s724_s3 + $0x8] sm:$0xff] %v507_v41   ;;  %543 = vst [vmem:[%s724_s3 + $0x28] sm:$0xff] %v527_v42   ;;  %v340_v47 = vadd.f32 %v584_v45, %v466_v16  ;;  %v348_v48 = vadd.f32 %v592_v46, %v466_v16  ;;  %v229_v49 = vpop.f32.mrb[5].mxu0  ;;  %v261_v50 = vpop.f32.mrb[5].mxu1 }
  0xff   :  { %503 = vst [vmem:[%s724_s3] sm:$0xff] %v502_v43   ;;  %542 = vst [vmem:[%s724_s3 + $0x20] sm:$0xff] %v522_v44   ;;  %v338_v51 = vadd.f32 %v466_v16, %v229_v49  ;;  %v346_v52 = vadd.f32 %v466_v16, %v261_v50  ;;  %v585_v53 = vpop.f32.mrb[6].mxu0  ;;  %v593_v54 = vpop.f32.mrb[6].mxu1 }
 0x100   :  { %v341_v55 = vadd.f32 %v585_v53, %v466_v16  ;;  %v349_v56 = vadd.f32 %v593_v54, %v466_v16  ;;  %v232_v57 = vpop.f32.mrb[7].mxu0  ;;  %v264_v58 = vpop.f32.mrb[7].mxu1  ;;  %v356_v61 = vmax.f32 %v340_v47, 0.0  ;;  %v364_v62 = vmax.f32 %v348_v48, 0.0 }
 0x101   :  { %v339_v59 = vadd.f32 %v466_v16, %v232_v57  ;;  %v347_v60 = vadd.f32 %v466_v16, %v264_v58  ;;  %v354_v1 = vmax.f32 %v338_v51, 0.0  ;;  %v362_v2 = vmax.f32 %v346_v52, 0.0 }
 0x102   :  { %v357_v63 = vmax.f32 %v341_v55, 0.0  ;;  %v365_v0 = vmax.f32 %v349_v56, 0.0 }
 0x103   :  { %v355_v3 = vmax.f32 %v339_v59, 0.0  ;;  %v363_v4 = vmax.f32 %v347_v60, 0.0 }
 0x104   :  { %v517_v5 = vpack.c.bf16 %v357_v63, %v356_v61  ;;  %v537_v6 = vpack.c.bf16 %v365_v0, %v364_v62 }
 0x105   :  { %v512_v7 = vpack.c.bf16 %v355_v3, %v354_v1  ;;  %v532_v8 = vpack.c.bf16 %v363_v4, %v362_v2 }
 0x106   :  { %541 = vst [vmem:[%s724_s3 + $0x18] sm:$0xff] %v517_v5   ;;  %545 = vst [vmem:[%s724_s3 + $0x38] sm:$0xff] %v537_v6  }
 0x107   :  { %540 = vst [vmem:[%s724_s3 + $0x10] sm:$0xff] %v512_v7   ;;  %544 = vst [vmem:[%s724_s3 + $0x30] sm:$0xff] %v532_v8  }

// kernel: encoder_forward.6
= control target key start
LH: loop header
LB: loop body
LE: loop exit
PB: predicated region body
PF: predicated region fallthrough
CT: control target
= control target key end

     0   :  { %s477_s1 = inlined_call_operand.vmem [shape: bf16[256,128], index: 1, kind: input, shape index: {}]   ;;  %s478_s0 = inlined_call_operand.vmem [shape: bf16[32,256], index: 0, kind: input, shape index: {}]   ;;  %s479_s2 = inlined_call_operand.vmem [shape: f32[1,128], index: 2, kind: input, shape index: {}]   ;;  %s480_s3 = inlined_call_operand.vmem [shape: bf16[32,128], index: 3, kind: output, shape index: {}]  }
   0x1   :  { %v366_v0 = vld [vmem:[%s477_s1 + $0x40] sm:$0xff]   ;;  %v368_v2 = vld [vmem:[%s477_s1 + $0x48] sm:$0xff]   ;;  %v370_v4 = vld [vmem:[%s477_s1 + $0x50] sm:$0xff]  }
   0x2   :  { %v367_v1 = vld [vmem:[%s477_s1] sm:$0xff]   ;;  %322 = vmatprep.subr.bf16.mxu0 %v366_v0  ;;  %350 = vmatprep.subr.bf16.mxu1 %v366_v0  ;;  %v369_v3 = vld [vmem:[%s477_s1 + $0x8] sm:$0xff]   ;;  %v371_v5 = vld [vmem:[%s477_s1 + $0x10] sm:$0xff]  }
   0x3   :  { %323 = vmatpush3.bf16.msra.mxu0 %v367_v1  ;;  %358 = vmatpush3.bf16.msra.mxu1 %v367_v1  ;;  %v372_v6 = vld [vmem:[%s477_s1 + $0x58] sm:$0xff]   ;;  %v374_v8 = vld [vmem:[%s477_s1 + $0x60] sm:$0xff]   ;;  %v376_v10 = vld [vmem:[%s477_s1 + $0x68] sm:$0xff]  }
   0x4   :  { %324 = vmatprep.subr.bf16.mxu0 %v368_v2  ;;  %351 = vmatprep.subr.bf16.mxu1 %v368_v2  ;;  %v373_v7 = vld [vmem:[%s477_s1 + $0x18] sm:$0xff]   ;;  %v375_v9 = vld [vmem:[%s477_s1 + $0x20] sm:$0xff]   ;;  %v377_v13 = vld [vmem:[%s477_s1 + $0x28] sm:$0xff]  }
   0x5   :  { %v384_v11 = vld [vmem:[%s478_s0 + $0x4] ss:$8 sps:$4 sm:$0xff]   ;;  %v387_v12 = vld [vmem:[%s478_s0 + $0x14] ss:$8 sps:$4 sm:$0xff]   ;;  %v382_v18 = vld [vmem:[%s478_s0] ss:$8 sps:$4 sm:$0xff]  }
   0x6   :  { %v378_v14 = vld [vmem:[%s477_s1 + $0x70] sm:$0xff]   ;;  %211 = vmatprep.mubr.bf16.mxu0 %v384_v11  ;;  %219 = vmatprep.mubr.bf16.mxu1 %v387_v12  ;;  %v380_v16 = vld [vmem:[%s477_s1 + $0x78] sm:$0xff]   ;;  %v302_v23 = vld [vmem:[%s479_s2] ss:$0 sm:$0xff] }
   0x7   :  { %325 = vmatpush3.bf16.msra.mxu0 %v369_v3  ;;  %359 = vmatpush3.bf16.msra.mxu1 %v369_v3  ;;  %v379_v15 = vld [vmem:[%s477_s1 + $0x30] sm:$0xff]   ;;  %v381_v17 = vld [vmem:[%s477_s1 + $0x38] sm:$0xff]  }
   0x8   :  { %326 = vmatprep.subr.bf16.mxu0 %v370_v4  ;;  %352 = vmatprep.subr.bf16.mxu1 %v370_v4  ;;  %v385_v19 = vld [vmem:[%s478_s0 + $0x10] ss:$8 sps:$4 sm:$0xff]  }
   0xb   :  { %327 = vmatpush3.bf16.msra.mxu0 %v371_v5  ;;  %360 = vmatpush3.bf16.msra.mxu1 %v371_v5 }
   0xc   :  { %328 = vmatprep.subr.bf16.mxu0 %v372_v6  ;;  %353 = vmatprep.subr.bf16.mxu1 %v372_v6 }
   0xf   :  { %329 = vmatpush3.bf16.msra.mxu0 %v373_v7  ;;  %361 = vmatpush3.bf16.msra.mxu1 %v373_v7 }
  0x10   :  { %330 = vmatprep.subr.bf16.mxu0 %v374_v8  ;;  %354 = vmatprep.subr.bf16.mxu1 %v374_v8 }
  0x13   :  { %331 = vmatpush3.bf16.msra.mxu0 %v375_v9  ;;  %362 = vmatpush3.bf16.msra.mxu1 %v375_v9 }
  0x14   :  { %332 = vmatprep.subr.bf16.mxu0 %v376_v10  ;;  %355 = vmatprep.subr.bf16.mxu1 %v376_v10 }
  0x17   :  { %333 = vmatpush3.bf16.msra.mxu0 %v377_v13  ;;  %363 = vmatpush3.bf16.msra.mxu1 %v377_v13 }
  0x18   :  { %334 = vmatprep.subr.bf16.mxu0 %v378_v14  ;;  %356 = vmatprep.subr.bf16.mxu1 %v378_v14 }
  0x1b   :  { %335 = vmatpush3.bf16.msra.mxu0 %v379_v15  ;;  %364 = vmatpush3.bf16.msra.mxu1 %v379_v15 }
  0x1c   :  { %336 = vmatprep.subr.bf16.mxu0 %v380_v16  ;;  %357 = vmatprep.subr.bf16.mxu1 %v380_v16 }
  0x1f   :  { %337 = vmatpush3.bf16.msra.mxu0 %v381_v17  ;;  %365 = vmatpush3.bf16.msra.mxu1 %v381_v17 }
  0x22   :  { %212 = vmatmul.mubr.bf16.vlgmr.msra.gmra.mrb[0].mxu0 %v382_v18  ;;  %220 = vmatmul.mubr.bf16.vlgmr.msra.gmra.mrb[0].mxu1 %v385_v19 }
  0xf5   :  { %v338_v20 = vpop.f32.mrb[0].mxu0  ;;  %v344_v21 = vpop.f32.mrb[0].mxu1 }
  0xf6   :  { %v339_v22 = vpop.f32.mrb[1].mxu0  ;;  %v345_v24 = vpop.f32.mrb[1].mxu1 }
  0xf7   :  { %v340_v25 = vadd.f32 %v339_v22, %v338_v20  ;;  %v346_v26 = vadd.f32 %v345_v24, %v344_v21  ;;  %v341_v27 = vpop.f32.mrb[2].mxu0  ;;  %v347_v28 = vpop.f32.mrb[2].mxu1 }
  0xf8   :  { %v342_v29 = vpop.f32.mrb[3].mxu0  ;;  %v348_v30 = vpop.f32.mrb[3].mxu1 }
  0xf9   :  { %v250_v31 = vadd.f32 %v340_v25, %v302_v23  ;;  %v252_v32 = vadd.f32 %v346_v26, %v302_v23  ;;  %v343_v33 = vadd.f32 %v342_v29, %v341_v27  ;;  %v349_v34 = vadd.f32 %v348_v30, %v347_v28 }
  0xfb   :  { %v251_v35 = vadd.f32 %v343_v33, %v302_v23  ;;  %v253_v36 = vadd.f32 %v349_v34, %v302_v23  ;;  %v254_v37 = vmax.f32 %v250_v31, 0.0  ;;  %v256_v38 = vmax.f32 %v252_v32, 0.0 }
  0xfd   :  { %v255_v39 = vmax.f32 %v251_v35, 0.0  ;;  %v257_v40 = vmax.f32 %v253_v36, 0.0 }
  0xff   :  { %v314_v41 = vpack.c.bf16 %v255_v39, %v254_v37  ;;  %v319_v42 = vpack.c.bf16 %v257_v40, %v256_v38 }
 0x101   :  { %315 = vst [vmem:[%s480_s3] sm:$0xff] %v314_v41   ;;  %321 = vst [vmem:[%s480_s3 + $0x8] sm:$0xff] %v319_v42  }

// kernel: encoder_forward.7
= control target key start
LH: loop header
LB: loop body
LE: loop exit
PB: predicated region body
PF: predicated region fallthrough
CT: control target
= control target key end

     0   :  { %s666_s1 = inlined_call_operand.vmem [shape: bf16[384,128], index: 1, kind: input, shape index: {}]   ;;  %s667_s0 = inlined_call_operand.vmem [shape: bf16[32,384], index: 0, kind: input, shape index: {}]   ;;  %s668_s2 = inlined_call_operand.vmem [shape: f32[1,128], index: 2, kind: input, shape index: {}]   ;;  %s669_s3 = inlined_call_operand.vmem [shape: bf16[32,128], index: 3, kind: output, shape index: {}]  }
   0x1   :  { %v515_v0 = vld [vmem:[%s666_s1 + $0x40] sm:$0xff]   ;;  %v518_v3 = vld [vmem:[%s666_s1 + $0x48] sm:$0xff]   ;;  %v521_v6 = vld [vmem:[%s666_s1 + $0x50] sm:$0xff]  }
   0x2   :  { %v516_v1 = vld [vmem:[%s666_s1] sm:$0xff]   ;;  %457 = vmatprep.subr.bf16.mxu0 %v515_v0  ;;  %v519_v4 = vld [vmem:[%s666_s1 + $0x8] sm:$0xff]   ;;  %v522_v7 = vld [vmem:[%s666_s1 + $0x10] sm:$0xff]  }
   0x3   :  { %v517_v2 = vld [vmem:[%s666_s1 + $0x80] sm:$0xff]   ;;  %458 = vmatpush3.bf16.msra.mxu0 %v516_v1  ;;  %v520_v5 = vld [vmem:[%s666_s1 + $0x88] sm:$0xff]   ;;  %v523_v8 = vld [vmem:[%s666_s1 + $0x90] sm:$0xff]  }
   0x4   :  { %495 = vmatprep.subr.bf16.mxu1 %v517_v2  ;;  %459 = vmatprep.subr.bf16.mxu0 %v518_v3  ;;  %v524_v9 = vld [vmem:[%s666_s1 + $0x58] sm:$0xff]   ;;  %v527_v12 = vld [vmem:[%s666_s1 + $0x60] sm:$0xff]   ;;  %v530_v15 = vld [vmem:[%s666_s1 + $0x68] sm:$0xff]  }
   0x5   :  { %496 = vmatpush3.bf16.msra.mxu1 %v517_v2  ;;  %v525_v10 = vld [vmem:[%s666_s1 + $0x18] sm:$0xff]   ;;  %v529_v13 = vld [vmem:[%s666_s1 + $0xa0] sm:$0xff]   ;;  %v532_v16 = vld [vmem:[%s666_s1 + $0xa8] sm:$0xff]  }
   0x6   :  { %497 = vmatprep.subr.bf16.mxu1 %v520_v5  ;;  %v526_v11 = vld [vmem:[%s666_s1 + $0x98] sm:$0xff]   ;;  %v528_v14 = vld [vmem:[%s666_s1 + $0x20] sm:$0xff]   ;;  %v531_v17 = vld [vmem:[%s666_s1 + $0x28] sm:$0xff]  }
   0x7   :  { %460 = vmatpush3.bf16.msra.mxu0 %v519_v4  ;;  %v533_v18 = vld [vmem:[%s666_s1 + $0x70] sm:$0xff]   ;;  %v536_v21 = vld [vmem:[%s666_s1 + $0x78] sm:$0xff]   ;;  %v539_v26 = vld [vmem:[%s667_s0] ss:$12 sps:$4 sm:$0xff]  }
   0x8   :  { %461 = vmatprep.subr.bf16.mxu0 %v521_v6  ;;  %v534_v19 = vld [vmem:[%s666_s1 + $0x30] sm:$0xff]   ;;  %v538_v22 = vld [vmem:[%s666_s1 + $0xb8] sm:$0xff]   ;;  %v543_v28 = vld [vmem:[%s667_s0 + $0x20] ss:$12 sps:$4 sm:$0xff]  }
   0x9   :  { %498 = vmatpush3.bf16.msra.mxu1 %v520_v5  ;;  %v535_v20 = vld [vmem:[%s666_s1 + $0xb0] sm:$0xff]   ;;  %v537_v25 = vld [vmem:[%s666_s1 + $0x38] sm:$0xff]   ;;  %v437_v40 = vld [vmem:[%s668_s2] ss:$0 sm:$0xff] }
   0xa   :  { %499 = vmatprep.subr.bf16.mxu1 %v523_v8  ;;  %v541_v23 = vld [vmem:[%s667_s0 + $0x4] ss:$12 sps:$4 sm:$0xff]   ;;  %v542_v24 = vld [vmem:[%s667_s0 + $0x8] ss:$12 sps:$4 sm:$0xff]  }
   0xb   :  { %462 = vmatpush3.bf16.msra.mxu0 %v522_v7  ;;  %291 = vmatprep.mubr.bf16.mxu0 %v541_v23  ;;  %v544_v27 = vld [vmem:[%s667_s0 + $0x1c] ss:$12 sps:$4 sm:$0xff]   ;;  %v546_v29 = vld [vmem:[%s667_s0 + $0x18] ss:$12 sps:$4 sm:$0xff]  }
   0xc   :  { %463 = vmatprep.subr.bf16.mxu0 %v524_v9  ;;  %511 = vmatprep.mubr.bf16.mxu1 %v542_v24 }
   0xd   :  { %500 = vmatpush3.bf16.msra.mxu1 %v523_v8 }
   0xe   :  { %501 = vmatprep.subr.bf16.mxu1 %v526_v11 }
   0xf   :  { %464 = vmatpush3.bf16.msra.mxu0 %v525_v10 }
  0x10   :  { %465 = vmatprep.subr.bf16.mxu0 %v527_v12 }
  0x11   :  { %502 = vmatpush3.bf16.msra.mxu1 %v526_v11 }
  0x12   :  { %503 = vmatprep.subr.bf16.mxu1 %v529_v13 }
  0x13   :  { %466 = vmatpush3.bf16.msra.mxu0 %v528_v14 }
  0x14   :  { %467 = vmatprep.subr.bf16.mxu0 %v530_v15 }
  0x15   :  { %504 = vmatpush3.bf16.msra.mxu1 %v529_v13 }
  0x16   :  { %505 = vmatprep.subr.bf16.mxu1 %v532_v16 }
  0x17   :  { %468 = vmatpush3.bf16.msra.mxu0 %v531_v17 }
  0x18   :  { %469 = vmatprep.subr.bf16.mxu0 %v533_v18 }
  0x19   :  { %506 = vmatpush3.bf16.msra.mxu1 %v532_v16 }
  0x1a   :  { %507 = vmatprep.subr.bf16.mxu1 %v535_v20 }
  0x1b   :  { %470 = vmatpush3.bf16.msra.mxu0 %v534_v19 }
  0x1c   :  { %471 = vmatprep.subr.bf16.mxu0 %v536_v21 }
  0x1d   :  { %508 = vmatpush3.bf16.msra.mxu1 %v535_v20 }
  0x1e   :  { %509 = vmatprep.subr.bf16.mxu1 %v538_v22 }
  0x1f   :  { %472 = vmatpush3.bf16.msra.mxu0 %v537_v25 }
  0x21   :  { %510 = vmatpush3.bf16.msra.mxu1 %v538_v22 }
  0x22   :  { %292 = vmatmul.mubr.bf16.vlgmr.msra.gmra.mrb[0].mxu0 %v539_v26 }
  0x23   :  { %299 = vmatprep.mubr.bf16.mxu0 %v544_v27 }
  0x24   :  { %512 = vmatmul.mubr.bf16.vlgmr.msra.gmra.mrb[0].mxu1 %v543_v28 }
  0x2a   :  { %300 = vmatmul.mubr.bf16.gmra.mrb[4].mxu0 %v546_v29 }
  0xf5   :  { %v473_v30 = vpop.f32.mrb[0].mxu0 }
  0xf6   :  { %v474_v31 = vpop.f32.mrb[1].mxu0 }
  0xf7   :  { %v475_v32 = vadd.f32 %v474_v31, %v473_v30  ;;  %v476_v33 = vpop.f32.mrb[2].mxu0  ;;  %v513_v34 = vpop.f32.mrb[0].mxu1 }
  0xf8   :  { %v477_v35 = vpop.f32.mrb[3].mxu0  ;;  %v342_v36 = vpop.f32.mrb[1].mxu1 }
  0xf9   :  { %v478_v37 = vadd.f32 %v477_v35, %v476_v33  ;;  %v343_v38 = vadd.f32 %v475_v32, %v342_v36  ;;  %v514_v39 = vpop.f32.mrb[2].mxu1 }
  0xfa   :  { %v345_v41 = vpop.f32.mrb[3].mxu1 }
  0xfb   :  { %v346_v42 = vadd.f32 %v478_v37, %v345_v41  ;;  %v379_v43 = vadd.f32 %v437_v40, %v343_v38 }
  0xfd   :  { %v380_v44 = vadd.f32 %v437_v40, %v346_v42  ;;  %v479_v45 = vpop.f32.mrb[4].mxu0 }
  0xfe   :  { %v480_v46 = vpop.f32.mrb[5].mxu0 }
  0xff   :  { %v449_v47 = vpack.c.bf16 %v380_v44, %v379_v43  ;;  %v481_v48 = vadd.f32 %v480_v46, %v479_v45  ;;  %v482_v49 = vpop.f32.mrb[6].mxu0 }
 0x100   :  { %v483_v50 = vpop.f32.mrb[7].mxu0 }
 0x101   :  { %450 = vst [vmem:[%s669_s3] sm:$0xff] %v449_v47   ;;  %v351_v51 = vadd.f32 %v513_v34, %v481_v48  ;;  %v484_v52 = vadd.f32 %v483_v50, %v482_v49 }
 0x103   :  { %v354_v53 = vadd.f32 %v514_v39, %v484_v52  ;;  %v381_v54 = vadd.f32 %v437_v40, %v351_v51 }
 0x105   :  { %v382_v55 = vadd.f32 %v437_v40, %v354_v53 }
 0x107   :  { %v454_v56 = vpack.c.bf16 %v382_v55, %v381_v54 }
 0x109   :  { %456 = vst [vmem:[%s669_s3 + $0x8] sm:$0xff] %v454_v56  }

// kernel: encoder_forward.9
= control target key start
LH: loop header
LB: loop body
LE: loop exit
PB: predicated region body
PF: predicated region fallthrough
CT: control target
= control target key end

     0   :  { %v725_v26 = vmov 0   ;;  %s883_s1 = inlined_call_operand.vmem [shape: bf16[384,128], index: 1, kind: input, shape index: {}]   ;;  %s884_s0 = inlined_call_operand.vmem [shape: bf16[32,384], index: 0, kind: input, shape index: {}]   ;;  %s885_s2 = inlined_call_operand.vmem [shape: bf16[128,128], index: 2, kind: input, shape index: {}]   ;;  %s886_s3 = inlined_call_operand.vmem [shape: bf16[32,128], index: 3, kind: input, shape index: {}]   ;;  %s887_s4 = inlined_call_operand.vmem [shape: bf16[32,128], index: 4, kind: output, shape index: {}]  }
   0x1   :  { %v693_v0 = vld [vmem:[%s883_s1 + $0x40] sm:$0xff]   ;;  %v696_v3 = vld [vmem:[%s883_s1 + $0x48] sm:$0xff]   ;;  %v699_v6 = vld [vmem:[%s883_s1 + $0x50] sm:$0xff]  }
   0x2   :  { %v694_v1 = vld [vmem:[%s883_s1] sm:$0xff]   ;;  %604 = vmatprep.subr.bf16.mxu0 %v693_v0  ;;  %v697_v4 = vld [vmem:[%s883_s1 + $0x8] sm:$0xff]   ;;  %v700_v7 = vld [vmem:[%s883_s1 + $0x10] sm:$0xff]  }
   0x3   :  { %v695_v2 = vld [vmem:[%s883_s1 + $0x80] sm:$0xff]   ;;  %605 = vmatpush3.bf16.msra.mxu0 %v694_v1  ;;  %v698_v5 = vld [vmem:[%s883_s1 + $0x88] sm:$0xff]   ;;  %v701_v8 = vld [vmem:[%s883_s1 + $0x90] sm:$0xff]  }
   0x4   :  { %652 = vmatprep.subr.bf16.mxu1 %v695_v2  ;;  %606 = vmatprep.subr.bf16.mxu0 %v696_v3  ;;  %v702_v9 = vld [vmem:[%s883_s1 + $0x58] sm:$0xff]   ;;  %v705_v12 = vld [vmem:[%s883_s1 + $0x60] sm:$0xff]   ;;  %v708_v15 = vld [vmem:[%s883_s1 + $0x68] sm:$0xff]  }
   0x5   :  { %653 = vmatpush3.bf16.msra.mxu1 %v695_v2  ;;  %v703_v10 = vld [vmem:[%s883_s1 + $0x18] sm:$0xff]   ;;  %v707_v13 = vld [vmem:[%s883_s1 + $0xa0] sm:$0xff]   ;;  %v710_v16 = vld [vmem:[%s883_s1 + $0xa8] sm:$0xff]  }
   0x6   :  { %654 = vmatprep.subr.bf16.mxu1 %v698_v5  ;;  %v704_v11 = vld [vmem:[%s883_s1 + $0x98] sm:$0xff]   ;;  %v706_v14 = vld [vmem:[%s883_s1 + $0x20] sm:$0xff]   ;;  %v709_v17 = vld [vmem:[%s883_s1 + $0x28] sm:$0xff]  }
   0x7   :  { %607 = vmatpush3.bf16.msra.mxu0 %v697_v4  ;;  %v711_v18 = vld [vmem:[%s883_s1 + $0x70] sm:$0xff]   ;;  %v714_v21 = vld [vmem:[%s883_s1 + $0x78] sm:$0xff]   ;;  %v26_v23 = vld [vmem:[%s884_s0] sm:$0xff] }
   0x8   :  { %608 = vmatprep.subr.bf16.mxu0 %v699_v6  ;;  %v712_v19 = vld [vmem:[%s883_s1 + $0x30] sm:$0xff]   ;;  %v716_v22 = vld [vmem:[%s883_s1 + $0xb8] sm:$0xff]   ;;  %v27_v25 = vld [vmem:[%s884_s0 + $0x8] sm:$0xf]  ;;  %v34_v27 = vmax.bf16 %v725_v26, %v26_v23 }
   0x9   :  { %655 = vmatpush3.bf16.msra.mxu1 %v698_v5  ;;  %v713_v20 = vld [vmem:[%s883_s1 + $0xb0] sm:$0xff]   ;;  %v35_v30 = vmax.bf16 %v725_v26, %v27_v25  ;;  %v31_v31 = vld [vmem:[%s884_s0 + $0x20] sm:$0xf]  ;;  %v33_v32 = vld [vmem:[%s884_s0 + $0x2c] sm:$0xf] }
   0xa   :  { %656 = vmatprep.subr.bf16.mxu1 %v701_v8  ;;  %v28_v24 = vld [vmem:[%s884_s0 + $0xc] sm:$0xff]  ;;  %v29_v29 = vld [vmem:[%s884_s0 + $0x14] sm:$0xf]  ;;  %v30_v34 = vld [vmem:[%s884_s0 + $0x18] sm:$0xff]  ;;  %v39_v41 = vmax.bf16 %v725_v26, %v31_v31  ;;  %v41_v42 = vmax.bf16 %v725_v26, %v33_v32 }
   0xb   :  { %609 = vmatpush3.bf16.msra.mxu0 %v700_v7  ;;  %v36_v28 = vmax.bf16 %v725_v26, %v28_v24  ;;  %v37_v33 = vmax.bf16 %v725_v26, %v29_v29  ;;  %v32_v35 = vld [vmem:[%s884_s0 + $0x24] sm:$0xff]  ;;  %v715_v36 = vld [vmem:[%s883_s1 + $0x38] sm:$0xff]   ;;  %v38_v38 = vmax.bf16 %v725_v26, %v30_v34  ;;  %v719_v48 = vld [vmem:[%s885_s2 + $0x10] sm:$0xff]  }
   0xc   :  { %610 = vmatprep.subr.bf16.mxu0 %v702_v9  ;;  %v40_v39 = vmax.bf16 %v725_v26, %v32_v35  ;;  %v717_v43 = vld [vmem:[%s885_s2] sm:$0xff]   ;;  %v718_v45 = vld [vmem:[%s885_s2 + $0x8] sm:$0xff]   ;;  %v543_v47 = vcombine.low %v39_v41, %v41_v42  ;;  %v720_v50 = vld [vmem:[%s885_s2 + $0x18] sm:$0xff]  }
   0xd   :  { %657 = vmatpush3.bf16.msra.mxu1 %v701_v8  ;;  %v539_v37 = vcombine.high %v34_v27, %v36_v28  ;;  %v540_v40 = vcombine.low %v35_v30, %v37_v33  ;;  %v538_v44 = vcombine.low %v34_v27, %v36_v28  ;;  %v721_v51 = vld [vmem:[%s885_s2 + $0x20] sm:$0xff]   ;;  %v722_v52 = vld [vmem:[%s885_s2 + $0x28] sm:$0xff]   ;;  %v723_v53 = vld [vmem:[%s885_s2 + $0x30] sm:$0xff]  }
   0xe   :  { %658 = vmatprep.subr.bf16.mxu1 %v704_v11  ;;  %v542_v46 = vcombine.high %v38_v38, %v40_v39  ;;  %v541_v49 = vcombine.low %v38_v38, %v40_v39  ;;  %v724_v54 = vld [vmem:[%s885_s2 + $0x38] sm:$0xff]  }
   0xf   :  { %611 = vmatpush3.bf16.msra.mxu0 %v703_v10  ;;  %302 = vmatprep.mubr.bf16.mxu0 %v539_v37 }
  0x10   :  { %612 = vmatprep.subr.bf16.mxu0 %v705_v12  ;;  %668 = vmatprep.mubr.bf16.mxu1 %v540_v40 }
  0x11   :  { %659 = vmatpush3.bf16.msra.mxu1 %v704_v11 }
  0x12   :  { %660 = vmatprep.subr.bf16.mxu1 %v707_v13 }
  0x13   :  { %613 = vmatpush3.bf16.msra.mxu0 %v706_v14 }
  0x14   :  { %614 = vmatprep.subr.bf16.mxu0 %v708_v15 }
  0x15   :  { %661 = vmatpush3.bf16.msra.mxu1 %v707_v13 }
  0x16   :  { %662 = vmatprep.subr.bf16.mxu1 %v710_v16 }
  0x17   :  { %615 = vmatpush3.bf16.msra.mxu0 %v709_v17  ;;  %v602_v17 = vld [vmem:[%s886_s3 + $0x8] sm:$0xff]  }
  0x18   :  { %616 = vmatprep.subr.bf16.mxu0 %v711_v18  ;;  %v585_v18 = vld [vmem:[%s886_s3] sm:$0xff]  }
  0x19   :  { %663 = vmatpush3.bf16.msra.mxu1 %v710_v16  ;;  %v587_v23 = vunpack.c.h.bf16 %v585_v18 }
  0x1a   :  { %664 = vmatprep.subr.bf16.mxu1 %v713_v20 }
  0x1b   :  { %617 = vmatpush3.bf16.msra.mxu0 %v712_v19  ;;  %v590_v19 = vunpack.c.l.bf16 %v602_v17 }
  0x1c   :  { %618 = vmatprep.subr.bf16.mxu0 %v714_v21  ;;  %v591_v21 = vunpack.c.h.bf16 %v602_v17 }
  0x1d   :  { %665 = vmatpush3.bf16.msra.mxu1 %v713_v20  ;;  %v586_v20 = vunpack.c.l.bf16 %v585_v18 }
  0x1e   :  { %666 = vmatprep.subr.bf16.mxu1 %v716_v22 }
  0x1f   :  { %619 = vmatpush3.bf16.msra.mxu0 %v715_v36 }
  0x20   :  { %672 = vmatprep.subr.bf16.mxu0 %v717_v43 }
  0x21   :  { %667 = vmatpush3.bf16.msra.mxu1 %v716_v22 }
  0x22   :  { %303 = vmatmul.mubr.bf16.vlgmr.msra.gmra.mrb[0].mxu0 %v538_v44 }
  0x23   :  { %310 = vmatprep.mubr.bf16.mxu0 %v542_v46  ;;  %673 = vmatpush3.bf16.msra.mxu0 %v717_v43 }
  0x24   :  { %669 = vmatmul.mubr.bf16.vlgmr.msra.gmra.mrb[0].mxu1 %v543_v47  ;;  %674 = vmatprep.subr.bf16.mxu0 %v718_v45 }
  0x27   :  { %675 = vmatpush3.bf16.msra.mxu0 %v718_v45 }
  0x28   :  { %676 = vmatprep.subr.bf16.mxu0 %v719_v48 }
  0x2a   :  { %311 = vmatmul.mubr.bf16.gmra.mrb[4].mxu0 %v541_v49 }
  0x2b   :  { %677 = vmatpush3.bf16.msra.mxu0 %v719_v48 }
  0x2c   :  { %678 = vmatprep.subr.bf16.mxu0 %v720_v50 }
  0x2f   :  { %679 = vmatpush3.bf16.msra.mxu0 %v720_v50 }
  0x30   :  { %680 = vmatprep.subr.bf16.mxu0 %v721_v51 }
  0x33   :  { %681 = vmatpush3.bf16.msra.mxu0 %v721_v51 }
  0x34   :  { %682 = vmatprep.subr.bf16.mxu0 %v722_v52 }
  0x37   :  { %683 = vmatpush3.bf16.msra.mxu0 %v722_v52 }
  0x38   :  { %684 = vmatprep.subr.bf16.mxu0 %v723_v53 }
  0x3b   :  { %685 = vmatpush3.bf16.msra.mxu0 %v723_v53 }
  0x3c   :  { %686 = vmatprep.subr.bf16.mxu0 %v724_v54 }
  0x3f   :  { %687 = vmatpush3.bf16.msra.mxu0 %v724_v54 }
  0xf5   :  { %v620_v55 = vpop.f32.mrb[0].mxu0 }
  0xf6   :  { %v621_v56 = vpop.f32.mrb[1].mxu0 }
  0xf7   :  { %v622_v57 = vadd.f32 %v621_v56, %v620_v55  ;;  %v623_v58 = vpop.f32.mrb[2].mxu0  ;;  %v670_v59 = vpop.f32.mrb[0].mxu1 }
  0xf8   :  { %v624_v60 = vpop.f32.mrb[3].mxu0  ;;  %v353_v61 = vpop.f32.mrb[1].mxu1 }
  0xf9   :  { %v625_v62 = vadd.f32 %v624_v60, %v623_v58  ;;  %v354_v63 = vadd.f32 %v622_v57, %v353_v61  ;;  %v671_v0 = vpop.f32.mrb[2].mxu1 }
  0xfa   :  { %v356_v1 = vpop.f32.mrb[3].mxu1 }
  0xfb   :  { %v357_v2 = vadd.f32 %v625_v62, %v356_v1  ;;  %v383_v3 = vmax.f32 %v354_v63, 0.0 }
  0xfd   :  { %v384_v4 = vmax.f32 %v357_v2, 0.0  ;;  %v626_v5 = vpop.f32.mrb[4].mxu0 }
  0xfe   :  { %v627_v6 = vpop.f32.mrb[5].mxu0 }
  0xff   :  { %v387_v7 = vpack.c.bf16 %v384_v4, %v383_v3  ;;  %v628_v8 = vadd.f32 %v627_v6, %v626_v5  ;;  %v629_v9 = vpop.f32.mrb[6].mxu0 }
 0x100   :  { %v630_v10 = vpop.f32.mrb[7].mxu0 }
 0x101   :  { %v362_v11 = vadd.f32 %v670_v59, %v628_v8  ;;  %v631_v12 = vadd.f32 %v630_v10, %v629_v9  ;;  %688 = vmatprep.mubr.bf16.mxu0 %v387_v7 }
 0x103   :  { %v365_v13 = vadd.f32 %v671_v0, %v631_v12  ;;  %v385_v14 = vmax.f32 %v362_v11, 0.0 }
 0x105   :  { %v386_v15 = vmax.f32 %v365_v13, 0.0 }
 0x107   :  { %v388_v16 = vpack.c.bf16 %v386_v15, %v385_v14 }
 0x109   :  { %689 = vmatmul.mubr.bf16.vlgmr.msra.gmra.mrb[8].mxu0 %v388_v16 }
 0x1dc   :  { %v690_v22 = vpop.f32.mrb[8].mxu0 }
 0x1dd   :  { %v504_v24 = vadd.f32 %v690_v22, %v590_v19  ;;  %v495_v25 = vpop.f32.mrb[9].mxu0 }
 0x1de   :  { %v496_v26 = vadd.f32 %v586_v20, %v495_v25  ;;  %v691_v27 = vpop.f32.mrb[10].mxu0 }
 0x1df   :  { %v507_v28 = vadd.f32 %v691_v27, %v591_v21  ;;  %v498_v29 = vpop.f32.mrb[11].mxu0  ;;  %v512_v31 = vmax.f32 %v504_v24, 0.0 }
 0x1e0   :  { %v499_v30 = vadd.f32 %v587_v23, %v498_v29  ;;  %v510_v33 = vmax.f32 %v496_v26, 0.0 }
 0x1e1   :  { %v513_v32 = vmax.f32 %v507_v28, 0.0 }
 0x1e2   :  { %v511_v34 = vmax.f32 %v499_v30, 0.0 }
 0x1e3   :  { %v600_v35 = vpack.c.bf16 %v513_v32, %v512_v31 }
 0x1e4   :  { %v595_v36 = vpack.c.bf16 %v511_v34, %v510_v33 }
 0x1e5   :  { %603 = vst [vmem:[%s887_s4 + $0x8] sm:$0xff] %v600_v35  }
 0x1e6   :  { %596 = vst [vmem:[%s887_s4] sm:$0xff] %v595_v36  }

// kernel: encoder_forward.8
= control target key start
LH: loop header
LB: loop body
LE: loop exit
PB: predicated region body
PF: predicated region fallthrough
CT: control target
= control target key end

     0   :  { %v721_v26 = vmov 0   ;;  %s879_s1 = inlined_call_operand.vmem [shape: bf16[384,128], index: 1, kind: input, shape index: {}]   ;;  %s880_s0 = inlined_call_operand.vmem [shape: bf16[32,384], index: 0, kind: input, shape index: {}]   ;;  %s881_s2 = inlined_call_operand.vmem [shape: bf16[128,128], index: 2, kind: input, shape index: {}]   ;;  %s882_s3 = inlined_call_operand.vmem [shape: bf16[32,128], index: 3, kind: input, shape index: {}]   ;;  %s883_s4 = inlined_call_operand.vmem [shape: bf16[32,128], index: 4, kind: output, shape index: {}]  }
   0x1   :  { %v689_v0 = vld [vmem:[%s879_s1 + $0x40] sm:$0xff]   ;;  %v692_v3 = vld [vmem:[%s879_s1 + $0x48] sm:$0xff]   ;;  %v695_v6 = vld [vmem:[%s879_s1 + $0x50] sm:$0xff]  }
   0x2   :  { %v690_v1 = vld [vmem:[%s879_s1] sm:$0xff]   ;;  %600 = vmatprep.subr.bf16.mxu0 %v689_v0  ;;  %v693_v4 = vld [vmem:[%s879_s1 + $0x8] sm:$0xff]   ;;  %v696_v7 = vld [vmem:[%s879_s1 + $0x10] sm:$0xff]  }
   0x3   :  { %v691_v2 = vld [vmem:[%s879_s1 + $0x80] sm:$0xff]   ;;  %601 = vmatpush3.bf16.msra.mxu0 %v690_v1  ;;  %v694_v5 = vld [vmem:[%s879_s1 + $0x88] sm:$0xff]   ;;  %v697_v8 = vld [vmem:[%s879_s1 + $0x90] sm:$0xff]  }
   0x4   :  { %648 = vmatprep.subr.bf16.mxu1 %v691_v2  ;;  %602 = vmatprep.subr.bf16.mxu0 %v692_v3  ;;  %v698_v9 = vld [vmem:[%s879_s1 + $0x58] sm:$0xff]   ;;  %v701_v12 = vld [vmem:[%s879_s1 + $0x60] sm:$0xff]   ;;  %v704_v15 = vld [vmem:[%s879_s1 + $0x68] sm:$0xff]  }
   0x5   :  { %649 = vmatpush3.bf16.msra.mxu1 %v691_v2  ;;  %v699_v10 = vld [vmem:[%s879_s1 + $0x18] sm:$0xff]   ;;  %v703_v13 = vld [vmem:[%s879_s1 + $0xa0] sm:$0xff]   ;;  %v706_v16 = vld [vmem:[%s879_s1 + $0xa8] sm:$0xff]  }
   0x6   :  { %650 = vmatprep.subr.bf16.mxu1 %v694_v5  ;;  %v700_v11 = vld [vmem:[%s879_s1 + $0x98] sm:$0xff]   ;;  %v702_v14 = vld [vmem:[%s879_s1 + $0x20] sm:$0xff]   ;;  %v705_v17 = vld [vmem:[%s879_s1 + $0x28] sm:$0xff]  }
   0x7   :  { %603 = vmatpush3.bf16.msra.mxu0 %v693_v4  ;;  %v707_v18 = vld [vmem:[%s879_s1 + $0x70] sm:$0xff]   ;;  %v710_v21 = vld [vmem:[%s879_s1 + $0x78] sm:$0xff]   ;;  %v26_v23 = vld [vmem:[%s880_s0] sm:$0xff] }
   0x8   :  { %604 = vmatprep.subr.bf16.mxu0 %v695_v6  ;;  %v708_v19 = vld [vmem:[%s879_s1 + $0x30] sm:$0xff]   ;;  %v712_v22 = vld [vmem:[%s879_s1 + $0xb8] sm:$0xff]   ;;  %v27_v25 = vld [vmem:[%s880_s0 + $0x8] sm:$0xf]  ;;  %v34_v27 = vmax.bf16 %v721_v26, %v26_v23 }
   0x9   :  { %651 = vmatpush3.bf16.msra.mxu1 %v694_v5  ;;  %v709_v20 = vld [vmem:[%s879_s1 + $0xb0] sm:$0xff]   ;;  %v35_v30 = vmax.bf16 %v721_v26, %v27_v25  ;;  %v31_v31 = vld [vmem:[%s880_s0 + $0x20] sm:$0xf]  ;;  %v33_v32 = vld [vmem:[%s880_s0 + $0x2c] sm:$0xf] }
   0xa   :  { %652 = vmatprep.subr.bf16.mxu1 %v697_v8  ;;  %v28_v24 = vld [vmem:[%s880_s0 + $0xc] sm:$0xff]  ;;  %v29_v29 = vld [vmem:[%s880_s0 + $0x14] sm:$0xf]  ;;  %v30_v34 = vld [vmem:[%s880_s0 + $0x18] sm:$0xff]  ;;  %v39_v41 = vmax.bf16 %v721_v26, %v31_v31  ;;  %v41_v42 = vmax.bf16 %v721_v26, %v33_v32 }
   0xb   :  { %605 = vmatpush3.bf16.msra.mxu0 %v696_v7  ;;  %v36_v28 = vmax.bf16 %v721_v26, %v28_v24  ;;  %v37_v33 = vmax.bf16 %v721_v26, %v29_v29  ;;  %v32_v35 = vld [vmem:[%s880_s0 + $0x24] sm:$0xff]  ;;  %v711_v36 = vld [vmem:[%s879_s1 + $0x38] sm:$0xff]   ;;  %v38_v38 = vmax.bf16 %v721_v26, %v30_v34  ;;  %v715_v48 = vld [vmem:[%s881_s2 + $0x10] sm:$0xff]  }
   0xc   :  { %606 = vmatprep.subr.bf16.mxu0 %v698_v9  ;;  %v40_v39 = vmax.bf16 %v721_v26, %v32_v35  ;;  %v713_v43 = vld [vmem:[%s881_s2] sm:$0xff]   ;;  %v714_v45 = vld [vmem:[%s881_s2 + $0x8] sm:$0xff]   ;;  %v539_v47 = vcombine.low %v39_v41, %v41_v42  ;;  %v716_v50 = vld [vmem:[%s881_s2 + $0x18] sm:$0xff]  }
   0xd   :  { %653 = vmatpush3.bf16.msra.mxu1 %v697_v8  ;;  %v535_v37 = vcombine.high %v34_v27, %v36_v28  ;;  %v536_v40 = vcombine.low %v35_v30, %v37_v33  ;;  %v534_v44 = vcombine.low %v34_v27, %v36_v28  ;;  %v717_v51 = vld [vmem:[%s881_s2 + $0x20] sm:$0xff]   ;;  %v718_v52 = vld [vmem:[%s881_s2 + $0x28] sm:$0xff]   ;;  %v719_v53 = vld [vmem:[%s881_s2 + $0x30] sm:$0xff]  }
   0xe   :  { %654 = vmatprep.subr.bf16.mxu1 %v700_v11  ;;  %v538_v46 = vcombine.high %v38_v38, %v40_v39  ;;  %v537_v49 = vcombine.low %v38_v38, %v40_v39  ;;  %v720_v54 = vld [vmem:[%s881_s2 + $0x38] sm:$0xff]  }
   0xf   :  { %607 = vmatpush3.bf16.msra.mxu0 %v699_v10  ;;  %302 = vmatprep.mubr.bf16.mxu0 %v535_v37 }
  0x10   :  { %608 = vmatprep.subr.bf16.mxu0 %v701_v12  ;;  %664 = vmatprep.mubr.bf16.mxu1 %v536_v40 }
  0x11   :  { %655 = vmatpush3.bf16.msra.mxu1 %v700_v11 }
  0x12   :  { %656 = vmatprep.subr.bf16.mxu1 %v703_v13 }
  0x13   :  { %609 = vmatpush3.bf16.msra.mxu0 %v702_v14 }
  0x14   :  { %610 = vmatprep.subr.bf16.mxu0 %v704_v15 }
  0x15   :  { %657 = vmatpush3.bf16.msra.mxu1 %v703_v13 }
  0x16   :  { %658 = vmatprep.subr.bf16.mxu1 %v706_v16 }
  0x17   :  { %611 = vmatpush3.bf16.msra.mxu0 %v705_v17  ;;  %v598_v17 = vld [vmem:[%s882_s3 + $0x8] sm:$0xff]  }
  0x18   :  { %612 = vmatprep.subr.bf16.mxu0 %v707_v18  ;;  %v581_v18 = vld [vmem:[%s882_s3] sm:$0xff]  }
  0x19   :  { %659 = vmatpush3.bf16.msra.mxu1 %v706_v16  ;;  %v583_v23 = vunpack.c.h.bf16 %v581_v18 }
  0x1a   :  { %660 = vmatprep.subr.bf16.mxu1 %v709_v20 }
  0x1b   :  { %613 = vmatpush3.bf16.msra.mxu0 %v708_v19  ;;  %v586_v19 = vunpack.c.l.bf16 %v598_v17 }
  0x1c   :  { %614 = vmatprep.subr.bf16.mxu0 %v710_v21 }
  0x1d   :  { %661 = vmatpush3.bf16.msra.mxu1 %v709_v20  ;;  %v587_v20 = vunpack.c.h.bf16 %v598_v17 }
  0x1e   :  { %662 = vmatprep.subr.bf16.mxu1 %v712_v22 }
  0x1f   :  { %615 = vmatpush3.bf16.msra.mxu0 %v711_v36 }
  0x20   :  { %668 = vmatprep.subr.bf16.mxu0 %v713_v43 }
  0x21   :  { %663 = vmatpush3.bf16.msra.mxu1 %v712_v22  ;;  %v582_v22 = vunpack.c.l.bf16 %v581_v18 }
  0x22   :  { %303 = vmatmul.mubr.bf16.vlgmr.msra.gmra.mrb[0].mxu0 %v534_v44 }
  0x23   :  { %310 = vmatprep.mubr.bf16.mxu0 %v538_v46  ;;  %669 = vmatpush3.bf16.msra.mxu0 %v713_v43 }
  0x24   :  { %665 = vmatmul.mubr.bf16.vlgmr.msra.gmra.mrb[0].mxu1 %v539_v47  ;;  %670 = vmatprep.subr.bf16.mxu0 %v714_v45 }
  0x27   :  { %671 = vmatpush3.bf16.msra.mxu0 %v714_v45 }
  0x28   :  { %672 = vmatprep.subr.bf16.mxu0 %v715_v48 }
  0x2a   :  { %311 = vmatmul.mubr.bf16.gmra.mrb[4].mxu0 %v537_v49 }
  0x2b   :  { %673 = vmatpush3.bf16.msra.mxu0 %v715_v48 }
  0x2c   :  { %674 = vmatprep.subr.bf16.mxu0 %v716_v50 }
  0x2f   :  { %675 = vmatpush3.bf16.msra.mxu0 %v716_v50 }
  0x30   :  { %676 = vmatprep.subr.bf16.mxu0 %v717_v51 }
  0x33   :  { %677 = vmatpush3.bf16.msra.mxu0 %v717_v51 }
  0x34   :  { %678 = vmatprep.subr.bf16.mxu0 %v718_v52 }
  0x37   :  { %679 = vmatpush3.bf16.msra.mxu0 %v718_v52 }
  0x38   :  { %680 = vmatprep.subr.bf16.mxu0 %v719_v53 }
  0x3b   :  { %681 = vmatpush3.bf16.msra.mxu0 %v719_v53 }
  0x3c   :  { %682 = vmatprep.subr.bf16.mxu0 %v720_v54 }
  0x3f   :  { %683 = vmatpush3.bf16.msra.mxu0 %v720_v54 }
  0xf5   :  { %v616_v55 = vpop.f32.mrb[0].mxu0 }
  0xf6   :  { %v617_v56 = vpop.f32.mrb[1].mxu0 }
  0xf7   :  { %v618_v57 = vadd.f32 %v617_v56, %v616_v55  ;;  %v619_v58 = vpop.f32.mrb[2].mxu0  ;;  %v666_v59 = vpop.f32.mrb[0].mxu1 }
  0xf8   :  { %v620_v60 = vpop.f32.mrb[3].mxu0  ;;  %v353_v61 = vpop.f32.mrb[1].mxu1 }
  0xf9   :  { %v621_v62 = vadd.f32 %v620_v60, %v619_v58  ;;  %v354_v63 = vadd.f32 %v618_v57, %v353_v61  ;;  %v667_v0 = vpop.f32.mrb[2].mxu1 }
  0xfa   :  { %v356_v1 = vpop.f32.mrb[3].mxu1 }
  0xfb   :  { %v357_v2 = vadd.f32 %v621_v62, %v356_v1  ;;  %v383_v3 = vmax.f32 %v354_v63, 0.0 }
  0xfd   :  { %v384_v4 = vmax.f32 %v357_v2, 0.0  ;;  %v622_v5 = vpop.f32.mrb[4].mxu0 }
  0xfe   :  { %v623_v6 = vpop.f32.mrb[5].mxu0 }
  0xff   :  { %v387_v7 = vpack.c.bf16 %v384_v4, %v383_v3  ;;  %v624_v8 = vadd.f32 %v623_v6, %v622_v5  ;;  %v625_v9 = vpop.f32.mrb[6].mxu0 }
 0x100   :  { %v626_v10 = vpop.f32.mrb[7].mxu0 }
 0x101   :  { %v362_v11 = vadd.f32 %v666_v59, %v624_v8  ;;  %v627_v12 = vadd.f32 %v626_v10, %v625_v9  ;;  %684 = vmatprep.mubr.bf16.mxu0 %v387_v7 }
 0x103   :  { %v365_v13 = vadd.f32 %v667_v0, %v627_v12  ;;  %v385_v14 = vmax.f32 %v362_v11, 0.0 }
 0x105   :  { %v386_v15 = vmax.f32 %v365_v13, 0.0 }
 0x107   :  { %v388_v16 = vpack.c.bf16 %v386_v15, %v385_v14 }
 0x109   :  { %685 = vmatmul.mubr.bf16.vlgmr.msra.gmra.mrb[8].mxu0 %v388_v16 }
 0x1dc   :  { %v686_v21 = vpop.f32.mrb[8].mxu0 }
 0x1dd   :  { %v495_v24 = vpop.f32.mrb[9].mxu0  ;;  %v504_v26 = vadd.f32 %v686_v21, %v586_v19 }
 0x1de   :  { %v687_v25 = vpop.f32.mrb[10].mxu0  ;;  %v496_v29 = vadd.f32 %v582_v22, %v495_v24 }
 0x1df   :  { %v507_v27 = vadd.f32 %v687_v25, %v587_v20  ;;  %v498_v28 = vpop.f32.mrb[11].mxu0 }
 0x1e0   :  { %v499_v30 = vadd.f32 %v583_v23, %v498_v28 }
 0x1e1   :  { %v596_v31 = vpack.c.bf16 %v507_v27, %v504_v26 }
 0x1e2   :  { %v591_v32 = vpack.c.bf16 %v499_v30, %v496_v29 }
 0x1e3   :  { %599 = vst [vmem:[%s883_s4 + $0x8] sm:$0xff] %v596_v31  }
 0x1e4   :  { %592 = vst [vmem:[%s883_s4] sm:$0xff] %v591_v32  }

</bundles_post_ra>
